<compile_context>
chip_gen: v7x
topology: tpu7x:2x2x1
jax: 0.10.0
libtpu: 0.0.40
codegen_flags: <defaults>
</compile_context>

<pallas_src>
import math
import numpy as np
import jax
import jax.numpy as jnp
from jax.experimental import pallas as pl
from jax.experimental.pallas import tpu as pltpu

NEG_SLOPE = 0.01
LANE_CHUNK = 256        # spatial positions per matmul; bounds VMEM values (v7x)


def _leaky(v):
    return jnp.where(v > 0, v, NEG_SLOPE * v)


def _chunks(total, step):
    return [(s, min(step, total - s)) for s in range(0, total, step)]


# ----------------------------- Pallas kernels -------------------------------

def _make_same_kernel(C, H, W):
    """dim_in == dim_out: conv3x3 s1 + leaky + conv3x3 s1 + x + leaky."""
    Wp = W + 2
    P = (H + 2) * Wp                 # flattened zero-padded spatial grid
    M = Wp + 1                       # lane margin >= max |tap shift|
    taps = [(kh - 1) * Wp + (kw - 1) for kh in range(3) for kw in range(3)]
    chunks = _chunks(P, LANE_CHUNK)

    def kernel(x_ref, w1_ref, w2_ref, mask_ref, out_ref, xpf_ref, hid_ref):
        # ---- zero-padded, flattened x in VMEM (padding done in-kernel) ----
        xpf_ref[...] = jnp.zeros_like(xpf_ref)
        for h in range(H):                      # once-per-image layout step
            dst = M + (h + 1) * Wp + 1
            xpf_ref[:, dst:dst + W] = x_ref[:, h * W:(h + 1) * W]

        w1 = w1_ref[...]                        # (C, 9C)  resident weights
        w2 = w2_ref[...]                        # (C, 9C)

        # ---- conv1 + leaky -> zero-padded hid kept in VMEM (fused) --------
        hid_ref[...] = jnp.zeros_like(hid_ref)
        for s0, sz in chunks:
            a = jnp.concatenate(                # im2col: 9 shifted windows
                [xpf_ref[:, M + d + s0: M + d + s0 + sz] for d in taps],
                axis=0)                         # (9C, sz)
            h1 = jnp.dot(w1, a, preferred_element_type=jnp.float32)
            hid_ref[:, M + s0: M + s0 + sz] = (
                _leaky(h1) * mask_ref[:, s0:s0 + sz])   # zero the pad ring

        # ---- conv2 + residual + leaky -> lane-dense output store ----------
        for s0, sz in chunks:
            a = jnp.concatenate(
                [hid_ref[:, M + d + s0: M + d + s0 + sz] for d in taps],
                axis=0)
            y = jnp.dot(w2, a, preferred_element_type=jnp.float32)
            y = y + xpf_ref[:, M + s0: M + s0 + sz]     # identity residual
            out_ref[:, s0:s0 + sz] = _leaky(y)

    return kernel, P, M


def _make_down_kernel(Ci, Co, Ho, Wo):
    """dim_in != dim_out: conv3x3 s2 + leaky + conv3x3 s1 + conv1x1 s2 + leaky."""
    Wq = Wo + 2
    Q = (Ho + 2) * Wq                # flattened zero-padded hid grid
    M = Wq + 1
    # stride-2 conv taps: (source phase index, lane shift on the hid grid)
    taps1 = [((kh % 2) * 2 + (kw % 2), (kh // 2) * Wq + (kw // 2))
             for kh in range(3) for kw in range(3)]
    taps2 = [(kh - 1) * Wq + (kw - 1) for kh in range(3) for kw in range(3)]
    chunks = _chunks(Q, LANE_CHUNK)

    def kernel(xph_ref, w1_ref, w2_ref, ws_ref, mask_ref, out_ref,
               g_ref, hid_ref):
        # ---- place the four even/odd phases of x into padded VMEM scratch -
        g_ref[...] = jnp.zeros_like(g_ref)
        for g in range(4):                      # g encodes pad-phase (a, b)
            a, b = divmod(g, 2)
            src = 3 - g                         # x phase (1-a, 1-b)
            u0, v0 = 2 - a, 2 - b
            for r in range(Ho):
                dst = M + (u0 + r) * Wq + v0
                g_ref[g, :, dst:dst + Wo] = xph_ref[src, :, r * Wo:(r + 1) * Wo]

        w1 = w1_ref[...]                        # (Co, 9Ci)
        w2 = w2_ref[...]                        # (Co, 9Co)
        ws = ws_ref[...]                        # (Co, Ci)

        # ---- conv1 (3x3 stride 2) + leaky -> zero-padded hid in VMEM ------
        hid_ref[...] = jnp.zeros_like(hid_ref)
        for s0, sz in chunks:
            a1 = jnp.concatenate(
                [g_ref[g, :, M + d + s0: M + d + s0 + sz] for g, d in taps1],
                axis=0)                         # (9Ci, sz)
            h1 = jnp.dot(w1, a1, preferred_element_type=jnp.float32)
            hid_ref[:, M + s0: M + s0 + sz] = (
                _leaky(h1) * mask_ref[:, s0:s0 + sz])

        # ---- conv2 (3x3) + 1x1 stride-2 shortcut + leaky -> output --------
        for s0, sz in chunks:
            a2 = jnp.concatenate(
                [hid_ref[:, M + d + s0: M + d + s0 + sz] for d in taps2],
                axis=0)                         # (9Co, sz)
            y = jnp.dot(w2, a2, preferred_element_type=jnp.float32)
            y = y + jnp.dot(ws, g_ref[3, :, M + s0: M + s0 + sz],
                            preferred_element_type=jnp.float32)
            out_ref[:, s0:s0 + sz] = _leaky(y)

    return kernel, Q, M


# ------------------------------ module port ---------------------------------

def _xavier_conv(key, kh, kw, cin, cout):
    # matches nn.init.xavier_uniform_ bounds for a (cout, cin, kh, kw) conv
    fan_in = cin * kh * kw
    fan_out = cout * kh * kw
    bound = math.sqrt(6.0 / (fan_in + fan_out))
    return jax.random.uniform(key, (kh, kw, cin, cout), jnp.float32, -bound, bound)


class ResnetBlockPallas:
    """Pallas port of modelSVR.resnet_block (forward only, bias-free convs)."""

    def __init__(self, dim_in, dim_out, key):
        self.dim_in = int(dim_in)
        self.dim_out = int(dim_out)
        if self.dim_in == self.dim_out:
            k1, k2 = jax.random.split(key, 2)
            self.w1_hwio = _xavier_conv(k1, 3, 3, dim_in, dim_out)
            self.w2_hwio = _xavier_conv(k2, 3, 3, dim_out, dim_out)
            self.ws_hwio = None
        else:
            k1, k2, k3 = jax.random.split(key, 3)
            self.w1_hwio = _xavier_conv(k1, 3, 3, dim_in, dim_out)
            self.w2_hwio = _xavier_conv(k2, 3, 3, dim_out, dim_out)
            self.ws_hwio = _xavier_conv(k3, 1, 1, dim_in, dim_out)
        # kernel-layout weights: (Cout, 9*Cin) so each conv is one MXU matmul
        self.w1_k = self.w1_hwio.reshape(9 * self.dim_in, self.dim_out).T
        self.w2_k = self.w2_hwio.reshape(9 * self.dim_out, self.dim_out).T
        self.ws_k = (None if self.ws_hwio is None
                     else self.ws_hwio.reshape(self.dim_in, self.dim_out).T)

    def __call__(self, x_nchw):
        x = x_nchw.astype(jnp.float32)
        n, c, h, w = x.shape
        assert c == self.dim_in
        co = self.dim_out
        params = pltpu.CompilerParams(
            dimension_semantics=("parallel",),            # megacore / v7x 2 TCs
            vmem_limit_bytes=32 * 1024 * 1024)            # explicit VMEM budget

        if self.dim_in == self.dim_out:
            kernel, P, M = _make_same_kernel(c, h, w)
            msk = np.zeros((h + 2, w + 2), np.float32)
            msk[1:-1, 1:-1] = 1.0
            msk = jnp.asarray(msk.reshape(1, P))
            flops = 4 * n * P * 9 * c * co
            bytes_acc = 4 * (n * c * h * w + n * co * P + 2 * 9 * c * co + P)
            out_flat = pl.pallas_call(
                kernel,
                out_shape=jax.ShapeDtypeStruct((n, co, P), jnp.float32),
                grid_spec=pltpu.PrefetchScalarGridSpec(
                    num_scalar_prefetch=0,
                    grid=(n,),
                    in_specs=[
                        pl.BlockSpec((None, c, h * w), lambda i: (i, 0, 0)),
                        pl.BlockSpec((co, 9 * c), lambda i: (0, 0)),   # resident
                        pl.BlockSpec((co, 9 * co), lambda i: (0, 0)),  # resident
                        pl.BlockSpec((1, P), lambda i: (0, 0)),        # resident
                    ],
                    out_specs=pl.BlockSpec((None, co, P), lambda i: (i, 0, 0)),
                    scratch_shapes=[
                        pltpu.VMEM((c, P + 2 * M), jnp.float32),   # padded x
                        pltpu.VMEM((co, P + 2 * M), jnp.float32),  # padded hid
                    ]),
                compiler_params=params,
                cost_estimate=pl.CostEstimate(
                    flops=flops, transcendentals=0, bytes_accessed=bytes_acc),
            )(x.reshape(n, c, h * w), self.w1_k, self.w2_k, msk)
            out = out_flat.reshape(n, co, h + 2, w + 2)[:, :, 1:h + 1, 1:w + 1]
        else:
            assert h % 2 == 0 and w % 2 == 0, "downsample branch assumes even H, W"
            ho, wo = h // 2, w // 2
            kernel, Q, M = _make_down_kernel(c, co, ho, wo)
            # Four stride-2 phases of x (free strided slice; no padded copies,
            # no separate xs array — the shortcut reuses phase (0,0) in-kernel).
            # TODO(synk): move the phase split in-kernel via sublane-strided
            # ref reads; kept as a wrapper-side XLA strided slice for now.
            xph = jnp.stack(
                [x[:, :, a::2, b::2].reshape(n, c, ho * wo)
                 for a in (0, 1) for b in (0, 1)], axis=1)   # (N, 4, C, Ho*Wo)
            msk = np.zeros((ho + 2, wo + 2), np.float32)
            msk[1:-1, 1:-1] = 1.0
            msk = jnp.asarray(msk.reshape(1, Q))
            flops = 2 * n * Q * (9 * c * co + 9 * co * co + c * co)
            bytes_acc = 4 * (n * 4 * c * ho * wo + n * co * Q
                             + 9 * c * co + 9 * co * co + c * co + Q)
            out_flat = pl.pallas_call(
                kernel,
                out_shape=jax.ShapeDtypeStruct((n, co, Q), jnp.float32),
                grid_spec=pltpu.PrefetchScalarGridSpec(
                    num_scalar_prefetch=0,
                    grid=(n,),
                    in_specs=[
                        pl.BlockSpec((None, 4, c, ho * wo),
                                     lambda i: (i, 0, 0, 0)),
                        pl.BlockSpec((co, 9 * c), lambda i: (0, 0)),
                        pl.BlockSpec((co, 9 * co), lambda i: (0, 0)),
                        pl.BlockSpec((co, c), lambda i: (0, 0)),
                        pl.BlockSpec((1, Q), lambda i: (0, 0)),
                    ],
                    out_specs=pl.BlockSpec((None, co, Q), lambda i: (i, 0, 0)),
                    scratch_shapes=[
                        pltpu.VMEM((4, c, Q + 2 * M), jnp.float32),  # phases
                        pltpu.VMEM((co, Q + 2 * M), jnp.float32),    # hid
                    ]),
                compiler_params=params,
                cost_estimate=pl.CostEstimate(
                    flops=flops, transcendentals=0, bytes_accessed=bytes_acc),
            )(xph, self.w1_k, self.w2_k, self.ws_k, msk)
            out = out_flat.reshape(n, co, ho + 2, wo + 2)[:, :, 1:ho + 1, 1:wo + 1]
        return out


# ---------------------------- pure-JAX reference ----------------------------

def _conv_ref(x_nhwc, w_hwio, stride, pad):
    return jax.lax.conv_general_dilated(
        x_nhwc, w_hwio, window_strides=(stride, stride),
        padding=((pad, pad), (pad, pad)),
        dimension_numbers=('NHWC', 'HWIO', 'NHWC'),
        precision=jax.lax.Precision.HIGHEST)


def resnet_block_ref(block, x_nchw):
    x = jnp.transpose(x_nchw.astype(jnp.float32), (0, 2, 3, 1))
    if block.dim_in == block.dim_out:
        hid = _leaky(_conv_ref(x, block.w1_hwio, 1, 1))
        hid = _conv_ref(hid, block.w2_hwio, 1, 1)
        out = _leaky(hid + x)
    else:
        hid = _leaky(_conv_ref(x, block.w1_hwio, 2, 1))
        hid = _conv_ref(hid, block.w2_hwio, 1, 1)
        sc = _conv_ref(x, block.ws_hwio, 2, 0)
        out = _leaky(hid + sc)
    return jnp.transpose(out, (0, 3, 1, 2))


# ---------------------------------- main -------------------------------------

if __name__ == "__main__":
    key = jax.random.PRNGKey(0)
    kx, kb1, kb2 = jax.random.split(key, 3)
    n, c, h, w = 2, 8, 16, 16
    x = jax.random.normal(kx, (n, c, h, w), jnp.float32)

    # Case 1: dim_in == dim_out (stride-1 convs, identity residual)
    blk_same = ResnetBlockPallas(c, c, kb1)
    y_same = jax.block_until_ready(blk_same(x))
    ref_same = resnet_block_ref(blk_same, x)
    assert y_same.shape == (n, c, h, w)
    np.testing.assert_allclose(np.asarray(y_same), np.asarray(ref_same),
                               rtol=2e-2, atol=2e-2)

    # Case 2: dim_in != dim_out (stride-2 conv_1 + 1x1 stride-2 projection)
    blk_down = ResnetBlockPallas(c, 2 * c, kb2)
    y_down = jax.block_until_ready(blk_down(x))
    ref_down = resnet_block_ref(blk_down, x)
    assert y_down.shape == (n, 2 * c, h // 2, w // 2)
    np.testing.assert_allclose(np.asarray(y_down), np.asarray(ref_down),
                               rtol=2e-2, atol=2e-2)

    print("KERNEL_OK")
</pallas_src>

<mosaic_0001>
module attributes {stable_mosaic.version = 11 : i64} {
  func.func @kernel(%arg0: i32, %arg1: memref<1x8x256xf32, #tpu.memory_space<vmem>>, %arg2: memref<8x72xf32, #tpu.memory_space<vmem>>, %arg3: memref<8x72xf32, #tpu.memory_space<vmem>>, %arg4: memref<1x324xf32, #tpu.memory_space<vmem>>, %arg5: memref<1x8x324xf32, #tpu.memory_space<vmem>>, %arg6: memref<8x362xf32, #tpu.memory_space<vmem>>, %arg7: memref<8x362xf32, #tpu.memory_space<vmem>>) attributes {dimension_semantics = [#tpu.dimension_semantics<parallel>], iteration_bounds = array<i64: 2>, scalar_prefetch = 0 : i64, scratch_operands = 2 : i64, tpu.core_type = #tpu.core_type<tc>, window_params = [{transform_indices = @transform_0, window_bounds = array<i64: 1, 8, 256>}, {pipeline_mode = #tpu.pipeline_mode<synchronous>, transform_indices = @transform_1, window_bounds = array<i64: 8, 72>}, {pipeline_mode = #tpu.pipeline_mode<synchronous>, transform_indices = @transform_2, window_bounds = array<i64: 8, 72>}, {pipeline_mode = #tpu.pipeline_mode<synchronous>, transform_indices = @transform_3, window_bounds = array<i64: 1, 324>}, {transform_indices = @transform_4, window_bounds = array<i64: 1, 8, 324>}]} {
    %cst = arith.constant 0.000000e+00 : f32
    %0 = vector.broadcast %cst : f32 to vector<8x362xf32>
    %c0 = arith.constant 0 : index
    %c0_0 = arith.constant 0 : index
    %1 = vector.load %arg6[%c0, %c0_0] : memref<8x362xf32, #tpu.memory_space<vmem>>, vector<8x362xf32>
    tpu.vector_store %arg6[%c0, %c0_0], %0 {strides = array<i32>} : memref<8x362xf32, #tpu.memory_space<vmem>>, vector<8x362xf32>,
    %c0_1 = arith.constant 0 : index
    %c0_2 = arith.constant 0 : index
    %c0_3 = arith.constant 0 : index
    %2 = vector.load %arg1[%c0_1, %c0_2, %c0_3] : memref<1x8x256xf32, #tpu.memory_space<vmem>>, vector<1x8x16xf32>
    %3 = vector.shape_cast %2 : vector<1x8x16xf32> to vector<8x16xf32>
    %c0_4 = arith.constant 0 : index
    %c38 = arith.constant 38 : index
    %4 = vector.load %arg6[%c0_4, %c38] : memref<8x362xf32, #tpu.memory_space<vmem>>, vector<8x16xf32>
    tpu.vector_store %arg6[%c0_4, %c38], %3 {strides = array<i32>} : memref<8x362xf32, #tpu.memory_space<vmem>>, vector<8x16xf32>,
    %c0_5 = arith.constant 0 : index
    %c0_6 = arith.constant 0 : index
    %c16 = arith.constant 16 : index
    %5 = vector.load %arg1[%c0_5, %c0_6, %c16] : memref<1x8x256xf32, #tpu.memory_space<vmem>>, vector<1x8x16xf32>
    %6 = vector.shape_cast %5 : vector<1x8x16xf32> to vector<8x16xf32>
    %c0_7 = arith.constant 0 : index
    %c56 = arith.constant 56 : index
    %7 = vector.load %arg6[%c0_7, %c56] : memref<8x362xf32, #tpu.memory_space<vmem>>, vector<8x16xf32>
    tpu.vector_store %arg6[%c0_7, %c56], %6 {strides = array<i32>} : memref<8x362xf32, #tpu.memory_space<vmem>>, vector<8x16xf32>,
    %c0_8 = arith.constant 0 : index
    %c0_9 = arith.constant 0 : index
    %c32 = arith.constant 32 : index
    %8 = vector.load %arg1[%c0_8, %c0_9, %c32] : memref<1x8x256xf32, #tpu.memory_space<vmem>>, vector<1x8x16xf32>
    %9 = vector.shape_cast %8 : vector<1x8x16xf32> to vector<8x16xf32>
    %c0_10 = arith.constant 0 : index
    %c74 = arith.constant 74 : index
    %10 = vector.load %arg6[%c0_10, %c74] : memref<8x362xf32, #tpu.memory_space<vmem>>, vector<8x16xf32>
    tpu.vector_store %arg6[%c0_10, %c74], %9 {strides = array<i32>} : memref<8x362xf32, #tpu.memory_space<vmem>>, vector<8x16xf32>,
    %c0_11 = arith.constant 0 : index
    %c0_12 = arith.constant 0 : index
    %c48 = arith.constant 48 : index
    %11 = vector.load %arg1[%c0_11, %c0_12, %c48] : memref<1x8x256xf32, #tpu.memory_space<vmem>>, vector<1x8x16xf32>
    %12 = vector.shape_cast %11 : vector<1x8x16xf32> to vector<8x16xf32>
    %c0_13 = arith.constant 0 : index
    %c92 = arith.constant 92 : index
    %13 = vector.load %arg6[%c0_13, %c92] : memref<8x362xf32, #tpu.memory_space<vmem>>, vector<8x16xf32>
    tpu.vector_store %arg6[%c0_13, %c92], %12 {strides = array<i32>} : memref<8x362xf32, #tpu.memory_space<vmem>>, vector<8x16xf32>,
    %c0_14 = arith.constant 0 : index
    %c0_15 = arith.constant 0 : index
    %c64 = arith.constant 64 : index
    %14 = vector.load %arg1[%c0_14, %c0_15, %c64] : memref<1x8x256xf32, #tpu.memory_space<vmem>>, vector<1x8x16xf32>
    %15 = vector.shape_cast %14 : vector<1x8x16xf32> to vector<8x16xf32>
    %c0_16 = arith.constant 0 : index
    %c110 = arith.constant 110 : index
    %16 = vector.load %arg6[%c0_16, %c110] : memref<8x362xf32, #tpu.memory_space<vmem>>, vector<8x16xf32>
    tpu.vector_store %arg6[%c0_16, %c110], %15 {strides = array<i32>} : memref<8x362xf32, #tpu.memory_space<vmem>>, vector<8x16xf32>,
    %c0_17 = arith.constant 0 : index
    %c0_18 = arith.constant 0 : index
    %c80 = arith.constant 80 : index
    %17 = vector.load %arg1[%c0_17, %c0_18, %c80] : memref<1x8x256xf32, #tpu.memory_space<vmem>>, vector<1x8x16xf32>
    %18 = vector.shape_cast %17 : vector<1x8x16xf32> to vector<8x16xf32>
    %c0_19 = arith.constant 0 : index
    %c128 = arith.constant 128 : index
    %19 = vector.load %arg6[%c0_19, %c128] : memref<8x362xf32, #tpu.memory_space<vmem>>, vector<8x16xf32>
    tpu.vector_store %arg6[%c0_19, %c128], %18 {strides = array<i32>} : memref<8x362xf32, #tpu.memory_space<vmem>>, vector<8x16xf32>,
    %c0_20 = arith.constant 0 : index
    %c0_21 = arith.constant 0 : index
    %c96 = arith.constant 96 : index
    %20 = vector.load %arg1[%c0_20, %c0_21, %c96] : memref<1x8x256xf32, #tpu.memory_space<vmem>>, vector<1x8x16xf32>
    %21 = vector.shape_cast %20 : vector<1x8x16xf32> to vector<8x16xf32>
    %c0_22 = arith.constant 0 : index
    %c146 = arith.constant 146 : index
    %22 = vector.load %arg6[%c0_22, %c146] : memref<8x362xf32, #tpu.memory_space<vmem>>, vector<8x16xf32>
    tpu.vector_store %arg6[%c0_22, %c146], %21 {strides = array<i32>} : memref<8x362xf32, #tpu.memory_space<vmem>>, vector<8x16xf32>,
    %c0_23 = arith.constant 0 : index
    %c0_24 = arith.constant 0 : index
    %c112 = arith.constant 112 : index
    %23 = vector.load %arg1[%c0_23, %c0_24, %c112] : memref<1x8x256xf32, #tpu.memory_space<vmem>>, vector<1x8x16xf32>
    %24 = vector.shape_cast %23 : vector<1x8x16xf32> to vector<8x16xf32>
    %c0_25 = arith.constant 0 : index
    %c164 = arith.constant 164 : index
    %25 = vector.load %arg6[%c0_25, %c164] : memref<8x362xf32, #tpu.memory_space<vmem>>, vector<8x16xf32>
    tpu.vector_store %arg6[%c0_25, %c164], %24 {strides = array<i32>} : memref<8x362xf32, #tpu.memory_space<vmem>>, vector<8x16xf32>,
    %c0_26 = arith.constant 0 : index
    %c0_27 = arith.constant 0 : index
    %c128_28 = arith.constant 128 : index
    %26 = vector.load %arg1[%c0_26, %c0_27, %c128_28] : memref<1x8x256xf32, #tpu.memory_space<vmem>>, vector<1x8x16xf32>
    %27 = vector.shape_cast %26 : vector<1x8x16xf32> to vector<8x16xf32>
    %c0_29 = arith.constant 0 : index
    %c182 = arith.constant 182 : index
    %28 = vector.load %arg6[%c0_29, %c182] : memref<8x362xf32, #tpu.memory_space<vmem>>, vector<8x16xf32>
    tpu.vector_store %arg6[%c0_29, %c182], %27 {strides = array<i32>} : memref<8x362xf32, #tpu.memory_space<vmem>>, vector<8x16xf32>,
    %c0_30 = arith.constant 0 : index
    %c0_31 = arith.constant 0 : index
    %c144 = arith.constant 144 : index
    %29 = vector.load %arg1[%c0_30, %c0_31, %c144] : memref<1x8x256xf32, #tpu.memory_space<vmem>>, vector<1x8x16xf32>
    %30 = vector.shape_cast %29 : vector<1x8x16xf32> to vector<8x16xf32>
    %c0_32 = arith.constant 0 : index
    %c200 = arith.constant 200 : index
    %31 = vector.load %arg6[%c0_32, %c200] : memref<8x362xf32, #tpu.memory_space<vmem>>, vector<8x16xf32>
    tpu.vector_store %arg6[%c0_32, %c200], %30 {strides = array<i32>} : memref<8x362xf32, #tpu.memory_space<vmem>>, vector<8x16xf32>,
    %c0_33 = arith.constant 0 : index
    %c0_34 = arith.constant 0 : index
    %c160 = arith.constant 160 : index
    %32 = vector.load %arg1[%c0_33, %c0_34, %c160] : memref<1x8x256xf32, #tpu.memory_space<vmem>>, vector<1x8x16xf32>
    %33 = vector.shape_cast %32 : vector<1x8x16xf32> to vector<8x16xf32>
    %c0_35 = arith.constant 0 : index
    %c218 = arith.constant 218 : index
    %34 = vector.load %arg6[%c0_35, %c218] : memref<8x362xf32, #tpu.memory_space<vmem>>, vector<8x16xf32>
    tpu.vector_store %arg6[%c0_35, %c218], %33 {strides = array<i32>} : memref<8x362xf32, #tpu.memory_space<vmem>>, vector<8x16xf32>,
    %c0_36 = arith.constant 0 : index
    %c0_37 = arith.constant 0 : index
    %c176 = arith.constant 176 : index
    %35 = vector.load %arg1[%c0_36, %c0_37, %c176] : memref<1x8x256xf32, #tpu.memory_space<vmem>>, vector<1x8x16xf32>
    %36 = vector.shape_cast %35 : vector<1x8x16xf32> to vector<8x16xf32>
    %c0_38 = arith.constant 0 : index
    %c236 = arith.constant 236 : index
    %37 = vector.load %arg6[%c0_38, %c236] : memref<8x362xf32, #tpu.memory_space<vmem>>, vector<8x16xf32>
    tpu.vector_store %arg6[%c0_38, %c236], %36 {strides = array<i32>} : memref<8x362xf32, #tpu.memory_space<vmem>>, vector<8x16xf32>,
    %c0_39 = arith.constant 0 : index
    %c0_40 = arith.constant 0 : index
    %c192 = arith.constant 192 : index
    %38 = vector.load %arg1[%c0_39, %c0_40, %c192] : memref<1x8x256xf32, #tpu.memory_space<vmem>>, vector<1x8x16xf32>
    %39 = vector.shape_cast %38 : vector<1x8x16xf32> to vector<8x16xf32>
    %c0_41 = arith.constant 0 : index
    %c254 = arith.constant 254 : index
    %40 = vector.load %arg6[%c0_41, %c254] : memref<8x362xf32, #tpu.memory_space<vmem>>, vector<8x16xf32>
    tpu.vector_store %arg6[%c0_41, %c254], %39 {strides = array<i32>} : memref<8x362xf32, #tpu.memory_space<vmem>>, vector<8x16xf32>,
    %c0_42 = arith.constant 0 : index
    %c0_43 = arith.constant 0 : index
    %c208 = arith.constant 208 : index
    %41 = vector.load %arg1[%c0_42, %c0_43, %c208] : memref<1x8x256xf32, #tpu.memory_space<vmem>>, vector<1x8x16xf32>
    %42 = vector.shape_cast %41 : vector<1x8x16xf32> to vector<8x16xf32>
    %c0_44 = arith.constant 0 : index
    %c272 = arith.constant 272 : index
    %43 = vector.load %arg6[%c0_44, %c272] : memref<8x362xf32, #tpu.memory_space<vmem>>, vector<8x16xf32>
    tpu.vector_store %arg6[%c0_44, %c272], %42 {strides = array<i32>} : memref<8x362xf32, #tpu.memory_space<vmem>>, vector<8x16xf32>,
    %c0_45 = arith.constant 0 : index
    %c0_46 = arith.constant 0 : index
    %c224 = arith.constant 224 : index
    %44 = vector.load %arg1[%c0_45, %c0_46, %c224] : memref<1x8x256xf32, #tpu.memory_space<vmem>>, vector<1x8x16xf32>
    %45 = vector.shape_cast %44 : vector<1x8x16xf32> to vector<8x16xf32>
    %c0_47 = arith.constant 0 : index
    %c290 = arith.constant 290 : index
    %46 = vector.load %arg6[%c0_47, %c290] : memref<8x362xf32, #tpu.memory_space<vmem>>, vector<8x16xf32>
    tpu.vector_store %arg6[%c0_47, %c290], %45 {strides = array<i32>} : memref<8x362xf32, #tpu.memory_space<vmem>>, vector<8x16xf32>,
    %c0_48 = arith.constant 0 : index
    %c0_49 = arith.constant 0 : index
    %c240 = arith.constant 240 : index
    %47 = vector.load %arg1[%c0_48, %c0_49, %c240] : memref<1x8x256xf32, #tpu.memory_space<vmem>>, vector<1x8x16xf32>
    %48 = vector.shape_cast %47 : vector<1x8x16xf32> to vector<8x16xf32>
    %c0_50 = arith.constant 0 : index
    %c308 = arith.constant 308 : index
    %49 = vector.load %arg6[%c0_50, %c308] : memref<8x362xf32, #tpu.memory_space<vmem>>, vector<8x16xf32>
    tpu.vector_store %arg6[%c0_50, %c308], %48 {strides = array<i32>} : memref<8x362xf32, #tpu.memory_space<vmem>>, vector<8x16xf32>,
    %c0_51 = arith.constant 0 : index
    %c0_52 = arith.constant 0 : index
    %50 = vector.load %arg2[%c0_51, %c0_52] : memref<8x72xf32, #tpu.memory_space<vmem>>, vector<8x72xf32>
    %c0_53 = arith.constant 0 : index
    %c0_54 = arith.constant 0 : index
    %51 = vector.load %arg3[%c0_53, %c0_54] : memref<8x72xf32, #tpu.memory_space<vmem>>, vector<8x72xf32>
    %cst_55 = arith.constant 0.000000e+00 : f32
    %52 = vector.broadcast %cst_55 : f32 to vector<8x362xf32>
    %c0_56 = arith.constant 0 : index
    %c0_57 = arith.constant 0 : index
    %53 = vector.load %arg7[%c0_56, %c0_57] : memref<8x362xf32, #tpu.memory_space<vmem>>, vector<8x362xf32>
    tpu.vector_store %arg7[%c0_56, %c0_57], %52 {strides = array<i32>} : memref<8x362xf32, #tpu.memory_space<vmem>>, vector<8x362xf32>,
    %c0_58 = arith.constant 0 : index
    %c0_59 = arith.constant 0 : index
    %54 = vector.load %arg6[%c0_58, %c0_59] : memref<8x362xf32, #tpu.memory_space<vmem>>, vector<8x256xf32>
    %c0_60 = arith.constant 0 : index
    %c1 = arith.constant 1 : index
    %55 = vector.load %arg6[%c0_60, %c1] : memref<8x362xf32, #tpu.memory_space<vmem>>, vector<8x256xf32>
    %c0_61 = arith.constant 0 : index
    %c2 = arith.constant 2 : index
    %56 = vector.load %arg6[%c0_61, %c2] : memref<8x362xf32, #tpu.memory_space<vmem>>, vector<8x256xf32>
    %c0_62 = arith.constant 0 : index
    %c18 = arith.constant 18 : index
    %57 = vector.load %arg6[%c0_62, %c18] : memref<8x362xf32, #tpu.memory_space<vmem>>, vector<8x256xf32>
    %c0_63 = arith.constant 0 : index
    %c19 = arith.constant 19 : index
    %58 = vector.load %arg6[%c0_63, %c19] : memref<8x362xf32, #tpu.memory_space<vmem>>, vector<8x256xf32>
    %c0_64 = arith.constant 0 : index
    %c20 = arith.constant 20 : index
    %59 = vector.load %arg6[%c0_64, %c20] : memref<8x362xf32, #tpu.memory_space<vmem>>, vector<8x256xf32>
    %c0_65 = arith.constant 0 : index
    %c36 = arith.constant 36 : index
    %60 = vector.load %arg6[%c0_65, %c36] : memref<8x362xf32, #tpu.memory_space<vmem>>, vector<8x256xf32>
    %c0_66 = arith.constant 0 : index
    %c37 = arith.constant 37 : index
    %61 = vector.load %arg6[%c0_66, %c37] : memref<8x362xf32, #tpu.memory_space<vmem>>, vector<8x256xf32>
    %c0_67 = arith.constant 0 : index
    %c38_68 = arith.constant 38 : index
    %62 = vector.load %arg6[%c0_67, %c38_68] : memref<8x362xf32, #tpu.memory_space<vmem>>, vector<8x256xf32>
    %63 = tpu.concatenate %54, %55, %56, %57, %58, %59, %60, %61, %62 in 0 : vector<8x256xf32>, vector<8x256xf32>, vector<8x256xf32>, vector<8x256xf32>, vector<8x256xf32>, vector<8x256xf32>, vector<8x256xf32>, vector<8x256xf32>, vector<8x256xf32> -> vector<72x256xf32>
    %cst_69 = arith.constant dense<0.000000e+00> : vector<8x256xf32>
    %64 = tpu.matmul %50, %63, %cst_69 {dimension_numbers = #tpu.dot_dimension_numbers<[1], [0], [0], [1], [0, 0, 1, 1], [], []>} : vector<8x72xf32>, vector<72x256xf32>, vector<8x256xf32> -> vector<8x256xf32>
    %cst_70 = arith.constant 0.000000e+00 : f32
    %65 = vector.broadcast %cst_70 : f32 to vector<8x256xf32>
    %66 = arith.cmpf ogt, %64, %65 : vector<8x256xf32>
    %cst_71 = arith.constant 0.00999999977 : f32
    %67 = vector.broadcast %cst_71 : f32 to vector<8x256xf32>
    %68 = arith.mulf %67, %64 : vector<8x256xf32>
    %69 = arith.select %66, %64, %68 : vector<8x256xi1>, vector<8x256xf32>
    %c0_72 = arith.constant 0 : index
    %c0_73 = arith.constant 0 : index
    %70 = vector.load %arg4[%c0_72, %c0_73] : memref<1x324xf32, #tpu.memory_space<vmem>>, vector<1x256xf32>
    %71 = vector.broadcast %70 : vector<1x256xf32> to vector<8x256xf32>
    %72 = arith.mulf %69, %71 : vector<8x256xf32>
    %c0_74 = arith.constant 0 : index
    %c19_75 = arith.constant 19 : index
    %73 = vector.load %arg7[%c0_74, %c19_75] : memref<8x362xf32, #tpu.memory_space<vmem>>, vector<8x256xf32>
    tpu.vector_store %arg7[%c0_74, %c19_75], %72 {strides = array<i32>} : memref<8x362xf32, #tpu.memory_space<vmem>>, vector<8x256xf32>,
    %c0_76 = arith.constant 0 : index
    %c256 = arith.constant 256 : index
    %74 = vector.load %arg6[%c0_76, %c256] : memref<8x362xf32, #tpu.memory_space<vmem>>, vector<8x68xf32>
    %c0_77 = arith.constant 0 : index
    %c257 = arith.constant 257 : index
    %75 = vector.load %arg6[%c0_77, %c257] : memref<8x362xf32, #tpu.memory_space<vmem>>, vector<8x68xf32>
    %c0_78 = arith.constant 0 : index
    %c258 = arith.constant 258 : index
    %76 = vector.load %arg6[%c0_78, %c258] : memref<8x362xf32, #tpu.memory_space<vmem>>, vector<8x68xf32>
    %c0_79 = arith.constant 0 : index
    %c274 = arith.constant 274 : index
    %77 = vector.load %arg6[%c0_79, %c274] : memref<8x362xf32, #tpu.memory_space<vmem>>, vector<8x68xf32>
    %c0_80 = arith.constant 0 : index
    %c275 = arith.constant 275 : index
    %78 = vector.load %arg6[%c0_80, %c275] : memref<8x362xf32, #tpu.memory_space<vmem>>, vector<8x68xf32>
    %c0_81 = arith.constant 0 : index
    %c276 = arith.constant 276 : index
    %79 = vector.load %arg6[%c0_81, %c276] : memref<8x362xf32, #tpu.memory_space<vmem>>, vector<8x68xf32>
    %c0_82 = arith.constant 0 : index
    %c292 = arith.constant 292 : index
    %80 = vector.load %arg6[%c0_82, %c292] : memref<8x362xf32, #tpu.memory_space<vmem>>, vector<8x68xf32>
    %c0_83 = arith.constant 0 : index
    %c293 = arith.constant 293 : index
    %81 = vector.load %arg6[%c0_83, %c293] : memref<8x362xf32, #tpu.memory_space<vmem>>, vector<8x68xf32>
    %c0_84 = arith.constant 0 : index
    %c294 = arith.constant 294 : index
    %82 = vector.load %arg6[%c0_84, %c294] : memref<8x362xf32, #tpu.memory_space<vmem>>, vector<8x68xf32>
    %83 = tpu.concatenate %74, %75, %76, %77, %78, %79, %80, %81, %82 in 0 : vector<8x68xf32>, vector<8x68xf32>, vector<8x68xf32>, vector<8x68xf32>, vector<8x68xf32>, vector<8x68xf32>, vector<8x68xf32>, vector<8x68xf32>, vector<8x68xf32> -> vector<72x68xf32>
    %cst_85 = arith.constant dense<0.000000e+00> : vector<8x68xf32>
    %84 = tpu.matmul %50, %83, %cst_85 {dimension_numbers = #tpu.dot_dimension_numbers<[1], [0], [0], [1], [0, 0, 1, 1], [], []>} : vector<8x72xf32>, vector<72x68xf32>, vector<8x68xf32> -> vector<8x68xf32>
    %cst_86 = arith.constant 0.000000e+00 : f32
    %85 = vector.broadcast %cst_86 : f32 to vector<8x68xf32>
    %86 = arith.cmpf ogt, %84, %85 : vector<8x68xf32>
    %cst_87 = arith.constant 0.00999999977 : f32
    %87 = vector.broadcast %cst_87 : f32 to vector<8x68xf32>
    %88 = arith.mulf %87, %84 : vector<8x68xf32>
    %89 = arith.select %86, %84, %88 : vector<8x68xi1>, vector<8x68xf32>
    %c0_88 = arith.constant 0 : index
    %c256_89 = arith.constant 256 : index
    %90 = vector.load %arg4[%c0_88, %c256_89] : memref<1x324xf32, #tpu.memory_space<vmem>>, vector<1x68xf32>
    %91 = vector.broadcast %90 : vector<1x68xf32> to vector<8x68xf32>
    %92 = arith.mulf %89, %91 : vector<8x68xf32>
    %c0_90 = arith.constant 0 : index
    %c275_91 = arith.constant 275 : index
    %93 = vector.load %arg7[%c0_90, %c275_91] : memref<8x362xf32, #tpu.memory_space<vmem>>, vector<8x68xf32>
    tpu.vector_store %arg7[%c0_90, %c275_91], %92 {strides = array<i32>} : memref<8x362xf32, #tpu.memory_space<vmem>>, vector<8x68xf32>,
    %c0_92 = arith.constant 0 : index
    %c0_93 = arith.constant 0 : index
    %94 = vector.load %arg7[%c0_92, %c0_93] : memref<8x362xf32, #tpu.memory_space<vmem>>, vector<8x256xf32>
    %c0_94 = arith.constant 0 : index
    %c1_95 = arith.constant 1 : index
    %95 = vector.load %arg7[%c0_94, %c1_95] : memref<8x362xf32, #tpu.memory_space<vmem>>, vector<8x256xf32>
    %c0_96 = arith.constant 0 : index
    %c2_97 = arith.constant 2 : index
    %96 = vector.load %arg7[%c0_96, %c2_97] : memref<8x362xf32, #tpu.memory_space<vmem>>, vector<8x256xf32>
    %c0_98 = arith.constant 0 : index
    %c18_99 = arith.constant 18 : index
    %97 = vector.load %arg7[%c0_98, %c18_99] : memref<8x362xf32, #tpu.memory_space<vmem>>, vector<8x256xf32>
    %c0_100 = arith.constant 0 : index
    %c19_101 = arith.constant 19 : index
    %98 = vector.load %arg7[%c0_100, %c19_101] : memref<8x362xf32, #tpu.memory_space<vmem>>, vector<8x256xf32>
    %c0_102 = arith.constant 0 : index
    %c20_103 = arith.constant 20 : index
    %99 = vector.load %arg7[%c0_102, %c20_103] : memref<8x362xf32, #tpu.memory_space<vmem>>, vector<8x256xf32>
    %c0_104 = arith.constant 0 : index
    %c36_105 = arith.constant 36 : index
    %100 = vector.load %arg7[%c0_104, %c36_105] : memref<8x362xf32, #tpu.memory_space<vmem>>, vector<8x256xf32>
    %c0_106 = arith.constant 0 : index
    %c37_107 = arith.constant 37 : index
    %101 = vector.load %arg7[%c0_106, %c37_107] : memref<8x362xf32, #tpu.memory_space<vmem>>, vector<8x256xf32>
    %c0_108 = arith.constant 0 : index
    %c38_109 = arith.constant 38 : index
    %102 = vector.load %arg7[%c0_108, %c38_109] : memref<8x362xf32, #tpu.memory_space<vmem>>, vector<8x256xf32>
    %103 = tpu.concatenate %94, %95, %96, %97, %98, %99, %100, %101, %102 in 0 : vector<8x256xf32>, vector<8x256xf32>, vector<8x256xf32>, vector<8x256xf32>, vector<8x256xf32>, vector<8x256xf32>, vector<8x256xf32>, vector<8x256xf32>, vector<8x256xf32> -> vector<72x256xf32>
    %cst_110 = arith.constant dense<0.000000e+00> : vector<8x256xf32>
    %104 = tpu.matmul %51, %103, %cst_110 {dimension_numbers = #tpu.dot_dimension_numbers<[1], [0], [0], [1], [0, 0, 1, 1], [], []>} : vector<8x72xf32>, vector<72x256xf32>, vector<8x256xf32> -> vector<8x256xf32>
    %c0_111 = arith.constant 0 : index
    %c19_112 = arith.constant 19 : index
    %105 = vector.load %arg6[%c0_111, %c19_112] : memref<8x362xf32, #tpu.memory_space<vmem>>, vector<8x256xf32>
    %106 = arith.addf %104, %105 : vector<8x256xf32>
    %cst_113 = arith.constant 0.000000e+00 : f32
    %107 = vector.broadcast %cst_113 : f32 to vector<8x256xf32>
    %108 = arith.cmpf ogt, %106, %107 : vector<8x256xf32>
    %cst_114 = arith.constant 0.00999999977 : f32
    %109 = vector.broadcast %cst_114 : f32 to vector<8x256xf32>
    %110 = arith.mulf %109, %106 : vector<8x256xf32>
    %111 = arith.select %108, %106, %110 : vector<8x256xi1>, vector<8x256xf32>
    %c0_115 = arith.constant 0 : index
    %c0_116 = arith.constant 0 : index
    %c0_117 = arith.constant 0 : index
    %112 = vector.load %arg5[%c0_115, %c0_116, %c0_117] : memref<1x8x324xf32, #tpu.memory_space<vmem>>, vector<1x8x256xf32>
    %113 = vector.shape_cast %112 : vector<1x8x256xf32> to vector<8x256xf32>
    %114 = vector.shape_cast %111 : vector<8x256xf32> to vector<1x8x256xf32>
    tpu.vector_store %arg5[%c0_115, %c0_116, %c0_117], %114 {strides = array<i32>} : memref<1x8x324xf32, #tpu.memory_space<vmem>>, vector<1x8x256xf32>,
    %c0_118 = arith.constant 0 : index
    %c256_119 = arith.constant 256 : index
    %115 = vector.load %arg7[%c0_118, %c256_119] : memref<8x362xf32, #tpu.memory_space<vmem>>, vector<8x68xf32>
    %c0_120 = arith.constant 0 : index
    %c257_121 = arith.constant 257 : index
    %116 = vector.load %arg7[%c0_120, %c257_121] : memref<8x362xf32, #tpu.memory_space<vmem>>, vector<8x68xf32>
    %c0_122 = arith.constant 0 : index
    %c258_123 = arith.constant 258 : index
    %117 = vector.load %arg7[%c0_122, %c258_123] : memref<8x362xf32, #tpu.memory_space<vmem>>, vector<8x68xf32>
    %c0_124 = arith.constant 0 : index
    %c274_125 = arith.constant 274 : index
    %118 = vector.load %arg7[%c0_124, %c274_125] : memref<8x362xf32, #tpu.memory_space<vmem>>, vector<8x68xf32>
    %c0_126 = arith.constant 0 : index
    %c275_127 = arith.constant 275 : index
    %119 = vector.load %arg7[%c0_126, %c275_127] : memref<8x362xf32, #tpu.memory_space<vmem>>, vector<8x68xf32>
    %c0_128 = arith.constant 0 : index
    %c276_129 = arith.constant 276 : index
    %120 = vector.load %arg7[%c0_128, %c276_129] : memref<8x362xf32, #tpu.memory_space<vmem>>, vector<8x68xf32>
    %c0_130 = arith.constant 0 : index
    %c292_131 = arith.constant 292 : index
    %121 = vector.load %arg7[%c0_130, %c292_131] : memref<8x362xf32, #tpu.memory_space<vmem>>, vector<8x68xf32>
    %c0_132 = arith.constant 0 : index
    %c293_133 = arith.constant 293 : index
    %122 = vector.load %arg7[%c0_132, %c293_133] : memref<8x362xf32, #tpu.memory_space<vmem>>, vector<8x68xf32>
    %c0_134 = arith.constant 0 : index
    %c294_135 = arith.constant 294 : index
    %123 = vector.load %arg7[%c0_134, %c294_135] : memref<8x362xf32, #tpu.memory_space<vmem>>, vector<8x68xf32>
    %124 = tpu.concatenate %115, %116, %117, %118, %119, %120, %121, %122, %123 in 0 : vector<8x68xf32>, vector<8x68xf32>, vector<8x68xf32>, vector<8x68xf32>, vector<8x68xf32>, vector<8x68xf32>, vector<8x68xf32>, vector<8x68xf32>, vector<8x68xf32> -> vector<72x68xf32>
    %cst_136 = arith.constant dense<0.000000e+00> : vector<8x68xf32>
    %125 = tpu.matmul %51, %124, %cst_136 {dimension_numbers = #tpu.dot_dimension_numbers<[1], [0], [0], [1], [0, 0, 1, 1], [], []>} : vector<8x72xf32>, vector<72x68xf32>, vector<8x68xf32> -> vector<8x68xf32>
    %c0_137 = arith.constant 0 : index
    %c275_138 = arith.constant 275 : index
    %126 = vector.load %arg6[%c0_137, %c275_138] : memref<8x362xf32, #tpu.memory_space<vmem>>, vector<8x68xf32>
    %127 = arith.addf %125, %126 : vector<8x68xf32>
    %cst_139 = arith.constant 0.000000e+00 : f32
    %128 = vector.broadcast %cst_139 : f32 to vector<8x68xf32>
    %129 = arith.cmpf ogt, %127, %128 : vector<8x68xf32>
    %cst_140 = arith.constant 0.00999999977 : f32
    %130 = vector.broadcast %cst_140 : f32 to vector<8x68xf32>
    %131 = arith.mulf %130, %127 : vector<8x68xf32>
    %132 = arith.select %129, %127, %131 : vector<8x68xi1>, vector<8x68xf32>
    %c0_141 = arith.constant 0 : index
    %c0_142 = arith.constant 0 : index
    %c256_143 = arith.constant 256 : index
    %133 = vector.load %arg5[%c0_141, %c0_142, %c256_143] : memref<1x8x324xf32, #tpu.memory_space<vmem>>, vector<1x8x68xf32>
    %134 = vector.shape_cast %133 : vector<1x8x68xf32> to vector<8x68xf32>
    %135 = vector.shape_cast %132 : vector<8x68xf32> to vector<1x8x68xf32>
    tpu.vector_store %arg5[%c0_141, %c0_142, %c256_143], %135 {strides = array<i32>} : memref<1x8x324xf32, #tpu.memory_space<vmem>>, vector<1x8x68xf32>,
    return
  }
  func.func @transform_0(%arg0: i32) -> (i32, i32, i32) {
    %c0_i32 = arith.constant 0 : i32
    %c0_i32_0 = arith.constant 0 : i32
    %c0_i32_1 = arith.constant 0 : i32
    return %arg0, %c0_i32, %c0_i32_0 : i32, i32, i32
  }
  func.func @transform_1(%arg0: i32) -> (i32, i32) {
    %c0_i32 = arith.constant 0 : i32
    %c0_i32_0 = arith.constant 0 : i32
    %c0_i32_1 = arith.constant 0 : i32
    return %c0_i32, %c0_i32_0 : i32, i32
  }
  func.func @transform_2(%arg0: i32) -> (i32, i32) {
    %c0_i32 = arith.constant 0 : i32
    %c0_i32_0 = arith.constant 0 : i32
    %c0_i32_1 = arith.constant 0 : i32
    return %c0_i32, %c0_i32_0 : i32, i32
  }
  func.func @transform_3(%arg0: i32) -> (i32, i32) {
    %c0_i32 = arith.constant 0 : i32
    %c0_i32_0 = arith.constant 0 : i32
    %c0_i32_1 = arith.constant 0 : i32
    return %c0_i32, %c0_i32_0 : i32, i32
  }
  func.func @transform_4(%arg0: i32) -> (i32, i32, i32) {
    %c0_i32 = arith.constant 0 : i32
    %c0_i32_0 = arith.constant 0 : i32
    %c0_i32_1 = arith.constant 0 : i32
    return %arg0, %c0_i32, %c0_i32_0 : i32, i32, i32
  }
}

</mosaic_0001>

<bundles_post_ra>
// kernel: tpu_custom_call.1
= control target key start
LH: loop header
LB: loop body
LE: loop exit
PB: predicated region body
PF: predicated region fallthrough
CT: control target
= control target key end

     0   :  { %9 = vsyncpa [#allocation5], 0  ;;  %s2024_s0 = inlined_call_operand.hbm [shape: f32[2,8,256], index: 0, kind: input, shape index: {}]   ;;  %s2025_s1 = inlined_call_operand.hbm [shape: f32[8,72], index: 1, kind: input, shape index: {}]   ;;  %s2026_s2 = inlined_call_operand.hbm [shape: f32[8,72], index: 2, kind: input, shape index: {}]   ;;  %s2027_s3 = inlined_call_operand.vmem [shape: f32[1,324], index: 3, kind: input, shape index: {}]   ;;  %s2028_s4 = inlined_call_operand.hbm [shape: f32[2,8,324], index: 4, kind: output, shape index: {}]  }
   0x1   :  { %11 = vsyncpa [#allocation5 + $0x1], 0 }
   0x2   :  { %12 = vsyncpa [#allocation8], 0 }
   0x3   :  { %13 = vsyncpa [#allocation6], 0 }
   0x4   :  { %15 = vsyncpa [#allocation6 + $0x1], 0  ;;  %s1664_s15 = smov 0   ;;  %s1666_s16 = smov 0  }
   0x5   :  { %s1668_s17 = smov 0   ;;  %s1670_s18 = smov 0  }
   0x6 LB: > { %s1685_s19 = sadd.s32 4294967295, %s1605_s18   ;;  %s1073_s20 = sadd.s32 4294967294, %s1605_s18   ;;  %s1605_s18 = sphi %s1670_s18, %s2048_s18   ;;  %s1601_s17 = sphi %s1668_s17, %s2047_s17   ;;  %s1597_s16 = sphi %s1666_s16, %s2046_s16   ;;  %s1593_s15 = sphi %s1664_s15, %s2045_s15  }
   0x7   : > { %p41_p0 = scmp.ne.s32.totalorder %s1597_s16, %s1593_s15  ;;  %p2029_p1 = scmp.eq.s32.totalorder %s1685_s19, 0 }
   0x8   : > { %p134_p3 = scmp.eq.s32.totalorder %s1073_s20, 1  ;;  %p1074_p5 = scmp.ge.s32.totalorder %s1605_s18, 1 }
   0x9   : > { %p1694_p4 = por %p2029_p1, %p41_p0  ;;  %p141_p7 = scmp.lt.s32.totalorder %s1605_s18, 3 }
   0xa   : > { %p1699_p6 = por %p134_p3, %p41_p0  ;;  %s1607_s24 = smov [#allocation7]  }
   0xb   : > { %s2032_s21 = scalar_select %p1694_p4, 1, 0 }
   0xc   : > { %s2033_s22 = scalar_select %p1699_p6, 1, 0 }
   0xd   : > { %p1704_p8 = pnand %p1074_p5, %p141_p7  ;;  %s154_s25 = sshll.u32 %s1607_s24, 4  ;;  %s155_s25 = int_to_ptr.vmem [resolvable:$true] %s154_s25 }
   0xe   : > { %s1608_s26 = smov [#allocation9]   ;;  %s1720_s29 = sadd.s32 1, %s1605_s18  }
   0xf   : > { %s2034_s23 = scalar_select %p1704_p8, 1, 0 }
  0x10   : > { %p1226_p10 = pneg %p1704_p8  ;;  %s165_s27 = sshll.u32 %s1608_s26, 4  ;;  %s1717_s27 = int_to_ptr.vmem [resolvable:$true] %s165_s27 }
  0x11   : > { %s25_s30 = ssub.s32 %s1605_s18, %s1720_s29  ;;  %s1449_s7 = scalar_lea.hbm %s2025_s1, 128 }
  0x12   : > { %p1713_p11 = pnand %p1226_p10, %p2029_p1  ;;  %p1450_p12 = scmp.ne.s32.totalorder %s2025_s1, %s1449_s7 }
  0x13   : > { %p1456_p5 = scmp.lt.u32.totalorder %s1449_s7, %s2025_s1 }
  0x14   : > { %p1451_p13 = pneg %p1713_p11 }
  0x16   : > { %p1452_p0 = pnand %p1451_p13, %p1450_p12 }
  0x18   : > { %p1453_p3 = pneg %p1452_p0 }
  0x1a   : > { %p1458_p7 = pnand %p1456_p5, %p1453_p3 }
  0x1c   : > { %1461 = shalt.err (!%p1458_p7)
}
  0x1d   : > { %s1462_s12 = scalar_lea.vmem %s155_s25, 128  ;;  %p1470_p2 = scmp.lt.s32.totalorder %s155_s25, %s155_s25 }
  0x1e   : > { %p1463_p10 = scmp.ne.s32.totalorder %s155_s25, %s1462_s12  ;;  %p1471_p6 = scmp.lt.s32.totalorder %s1462_s12, %s1462_s12 }
  0x20   : > { %p1465_p9 = pnand %p1463_p10, %p1451_p13  ;;  %p1472_p4 = por %p1471_p6, %p1470_p2 }
  0x22   : > { %p1466_p1 = pneg %p1465_p9 }
  0x24   : > { %p1473_p8 = pnand %p1472_p4, %p1466_p1 }
  0x26   : > { %1476 = shalt.err (!%p1473_p8)
}
  0x27   : > { %1229 = dma.hbm_to_vmem [thread:$0]  (!%p1713_p11), %s2025_s1, 128, %s155_s25, [#allocation8]  }
  0x28   : > { %s1477_s26 = scalar_lea.hbm %s2026_s2, 128 }
  0x29   : > { %p1478_p9 = scmp.ne.s32.totalorder %s2026_s2, %s1477_s26  ;;  %p1484_p4 = scmp.lt.u32.totalorder %s1477_s26, %s2026_s2 }
  0x2b   : > { %p1480_p2 = pnand %p1478_p9, %p1451_p13 }
  0x2d   : > { %p1481_p1 = pneg %p1480_p2 }
  0x2f   : > { %p1486_p6 = pnand %p1484_p4, %p1481_p1 }
  0x31   : > { %1489 = shalt.err (!%p1486_p6)
}
  0x32   : > { %s1490_s25 = scalar_lea.vmem %s1717_s27, 128  ;;  %p1498_p3 = scmp.lt.s32.totalorder %s1717_s27, %s1717_s27 }
  0x33   : > { %p1491_p8 = scmp.ne.s32.totalorder %s1717_s27, %s1490_s25  ;;  %p1499_p5 = scmp.lt.s32.totalorder %s1490_s25, %s1490_s25 }
  0x35   : > { %p1493_p12 = pnand %p1491_p8, %p1451_p13  ;;  %p1500_p7 = por %p1499_p5, %p1498_p3 }
  0x37   : > { %p1494_p0 = pneg %p1493_p12 }
  0x39   : > { %p1501_p10 = pnand %p1500_p7, %p1494_p0 }
  0x3b   : > { %1504 = shalt.err (!%p1501_p10)
}
  0x3c   : > { %1232 = dma.hbm_to_vmem [thread:$0]  (!%p1713_p11), %s2026_s2, 128, %s1717_s27, [#allocation8]  }
  0x3d   : > { %p26_p13 = scmp.eq.s32.totalorder %s25_s30, 0  ;;  %s28_s11 = sadd.s32 1, %s1601_s17 }
  0x3e   : > { %p35_p9 = scmp.ne.s32.totalorder %s1601_s17, %s1597_s16  ;;  %p36_p2 = scmp.eq.s32.totalorder %s1605_s18, 0 }
  0x3f   : > { %s1779_s28 = scalar_select %p26_p13, %s1601_s17, %s28_s11  }
  0x40   : > { %p37_p1 = por %p36_p2, %p35_p9  ;;  %p2036_p4 = scmp.eq.s32.totalorder %s1685_s19, 1 }
  0x41   : > { %p1243_p8 = scmp.lt.s32.totalorder %s1605_s18, 2  ;;  %s179_s13 = sand.u32 1, %s1601_s17  }
  0x42   : > { %p1783_p6 = por %p2036_p4, %p35_p9  ;;  %s1078_s14 = sshll.u32 %s179_s13, 4 }
  0x43   : > { %s1093_s20 = sshll.u32 %s1605_s18, 8  ;;  %s183_s30 = scalar_lea.vmem [#allocation4], %s1078_s14 }
  0x44   : > { %s1793_s27 = scalar_lea.hbm %s2024_s0, %s1093_s20  ;;  %s191_s5 = sshll.u32 %s183_s30, 4  ;;  %s1795_s5 = int_to_ptr.vmem [resolvable:$true] %s191_s5 }
  0x45   : > { %p1797_p11 = pnand %p1243_p8, %p37_p1  ;;  %s180_s7 = scalar_lea.sflag [#allocation5], %s179_s13 }
  0x46   : > { %s1505_s8 = scalar_lea.hbm %s1793_s27, 256  ;;  %s1510_s10 = scalar_lea.hbm %s2024_s0, 512 }
  0x47   : > { %p1506_p12 = scmp.ne.s32.totalorder %s1793_s27, %s1505_s8  ;;  %p1507_p0 = pneg %p1797_p11 }
  0x48   : > { %p1511_p7 = scmp.lt.u32.totalorder %s1793_s27, %s2024_s0  ;;  %p1512_p10 = scmp.lt.u32.totalorder %s1510_s10, %s1505_s8 }
  0x49   : > { %p1508_p3 = pnand %p1507_p0, %p1506_p12  ;;  %p1514_p9 = scmp.lt.u32.totalorder %s1505_s8, %s1793_s27 }
  0x4a   : > { %p1513_p13 = por %p1512_p10, %p1511_p7 }
  0x4b   : > { %p1509_p5 = pneg %p1508_p3 }
  0x4c   : > { %p1515_p2 = por %p1514_p9, %p1513_p13 }
  0x4e   : > { %p1516_p1 = pnand %p1515_p2, %p1509_p5 }
  0x50   : > { %1519 = shalt.err (!%p1516_p1)
}
  0x51   : > { %s1520_s13 = scalar_lea.vmem %s1795_s5, 256  ;;  %s1609_s20 = smov [#allocation4]  }
  0x52   : > { %p1521_p4 = scmp.ne.s32.totalorder %s1795_s5, %s1520_s13  ;;  %s1525_s24 = sshll.u32 %s1609_s20, 4  ;;  %s1526_s24 = int_to_ptr.vmem [resolvable:$false] %s1525_s24 }
  0x53   : > { %s1527_s26 = scalar_lea.vmem %s1526_s24, 512  ;;  %p1528_p3 = scmp.lt.s32.totalorder %s1795_s5, %s1526_s24 }
  0x54   : > { %p1523_p8 = pnand %p1521_p4, %p1507_p0  ;;  %p1529_p7 = scmp.lt.s32.totalorder %s1527_s26, %s1520_s13 }
  0x56   : > { %p1524_p12 = pneg %p1523_p8  ;;  %p1530_p10 = por %p1529_p7, %p1528_p3 }
  0x58   : > { %p1531_p13 = pnand %p1530_p10, %p1524_p12 }
  0x5a   : > { %1534 = shalt.err (!%p1531_p13)
}
  0x5b   : > { %1236 = dma.hbm_to_vmem [thread:$0]  (!%p1797_p11), %s1793_s27, 256, %s1795_s5, %s180_s7  }
  0x5c   : > { %p2039_p5 = scmp.ne.s32.totalorder %s2034_s23, 0 }
  0x5d   : > { %s1829_s30 = sand.u32 (!%p2039_p5), 1, %s1597_s16   ;;  %p2040_p0 = scmp.ne.s32.totalorder (!%p2039_p5), %s2032_s21, 0 }
  0x5e   : > { %200 = sbr.rel (%p2039_p5) target bundleno = 1137 (0x471), region = 36  ;;  %s1082_s8 = sshll.u32 (!%p2039_p5), %s1829_s30, 4 }
  0x5f   : > { %s203_s25 = scalar_lea.sflag (!%p2039_p5), [#allocation5], %s1829_s30  ;;  %s206_s9 = scalar_lea.vmem (!%p2039_p5), [#allocation4], %s1082_s8 }
  0x65   : > { %1580 = dma.done.wait (%p2040_p0), %s203_s25, 256  }
  0x66   : > { %1582 = vsyncadd (%p2040_p0), %s203_s25, 4294967040  ;;  %p2041_p9 = scmp.eq.s32.totalorder %s1685_s19, 0 }
  0x68   : > { %1584 = dma.done.wait (%p2041_p9), [#allocation8], 256   ;;  %p2042_p11 = pmov %p2041_p9 }
  0x69   : > { %v1610_v0 = vmov 0.0   ;;  %vm241_vm0 = vcmask 867328   ;;  %v292_v1 = vld [vmem:[%s206_s9] sm:$0xff]  ;;  %s1611_s21 = smov 52   ;;  %s1612_s23 = smov 48   ;;  %v299_v2 = vld [vmem:[%s206_s9 + $0x8] sm:$0xff] }
  0x6a   : > { %1586 = vsyncadd (%p2042_p11), [#allocation8], 4294967040  ;;  %240 = vst [vmem:[#allocation2 + $0x8] sm:$0xff] %v1610_v0  ;;  %524 = vmatprep.mubr.f32.mxu0 %v1610_v0  ;;  %294 = vrot.lane.b32.xlu1 %v292_v1, %s1611_s21  ;;  %s1613_s27 = smov 54   ;;  %s1614_s5 = smov 50   ;;  %vm283_vm1 = vcmask 130048  }
  0x6b   : > { %239 = vst [vmem:[#allocation2] sm:$0xff] %v1610_v0  ;;  %359 = vst [vmem:[#allocation3] sm:$0xff] %v1610_v0  ;;  %280 = vrot.lane.b32.xlu0 %v292_v1, %s1612_s23  ;;  %s1615_s6 = smov 56   ;;  %s1616_s7 = smov 38   ;;  %vm290_vm2 = vcmask 277648   ;;  %vm297_vm3 = vcmask 425248  }
  0x6c   : > { %242 = vst.msk [vmem:[#allocation2 + $0x10] sm:$0xff] %vm241_vm0, %v1610_v0  ;;  %361 = vst.msk [vmem:[#allocation3 + $0x10] sm:$0xff] %vm241_vm0, %v1610_v0  ;;  %s1617_s10 = smov 40   ;;  %s1618_s11 = smov 62   ;;  %vm304_vm4 = vcmask 572848   ;;  %vm311_vm5 = vcmask 720448  }
  0x6d   : > { %s1619_s14 = smov 64   ;;  %s1620_s13 = smov 58   ;;  %vm248_vm6 = vcmask 441648   ;;  %vm255_vm7 = vcmask 589248   ;;  %vm334_vm8 = vcmask 113664   ;;  %vm341_vm9 = vcmask 261248  }
  0x6e   : > { %301 = vrot.lane.b32.xlu1 %v299_v2, %s1613_s27  ;;  %s1621_s20 = smov 60   ;;  %s1622_s24 = smov 42   ;;  %vm318_vm10 = vcmask 868048   ;;  %vm325_vm11 = vcmask 1015648   ;;  %vm262_vm12 = vcmask 736848   ;;  %vm332_vm13 = vcmask 1048560  }
  0x6f   : > { %287 = vrot.lane.b32.xlu0 %v292_v1, %s1614_s5  ;;  %s1623_s26 = smov 44   ;;  %s1624_s8 = smov 66   ;;  %vm269_vm14 = vcmask 884448   ;;  %vm348_vm15 = vcmask 408848   ;;  %vm276_vm0 = vcmask 1032048   ;;  %v1627_v17 = vmov 0.0|0.0  }
  0x70   : > { %s1625_s25 = smov 46   ;;  %s1626_s9 = smov 68   ;;  %1172 = vmatprep.subr.bf16.mxu1 %v1627_v17 }
  0x71   : > { %s1628_s21 = smov 126   ;;  %s1629_s23 = smov 127  }
  0x72   : > { %308 = vrot.lane.b32.xlu1 %v299_v2, %s1615_s6  ;;  %s1630_s27 = smov 109   ;;  %s1631_s5 = smov 110  }
  0x73   : > { %245 = vrot.lane.b32.xlu0 %v292_v1, %s1616_s7  ;;  %s1632_s6 = smov 92   ;;  %s1633_s7 = smov 108  }
  0x76   : > { %252 = vrot.lane.b32.xlu1 %v292_v1, %s1617_s10  ;;  %s1634_s10 = smov 91  }
  0x77   : > { %329 = vrot.lane.b32.xlu0 %v299_v2, %s1618_s11  ;;  %s1636_s11 = smov 90  }
  0x7a   : > { %338 = vrot.lane.b32.xlu1 %v299_v2, %s1619_s14 }
  0x7b   : > { %315 = vrot.lane.b32.xlu0 %v299_v2, %s1620_s13 }
  0x7e   : > { %322 = vrot.lane.b32.xlu1 %v299_v2, %s1621_s20 }
  0x7f   : > { %259 = vrot.lane.b32.xlu0 %v292_v1, %s1622_s24 }
  0x82   : > { %266 = vrot.lane.b32.xlu1 %v292_v1, %s1623_s26  ;;  %s1637_s26 = smov 19  }
  0x83   : > { %345 = vrot.lane.b32.xlu0 %v299_v2, %s1624_s8  ;;  %s1212_s8 = smul.u32 24, %s1829_s30 }
  0x86   : > { %273 = vrot.lane.b32.xlu1 %v292_v1, %s1625_s25  ;;  %s1213_s25 = smul.u32 384, %s1685_s19  ;;  %s970_s19 = scalar_lea.sflag [#allocation6], %s1829_s30 }
  0x87   : > { %352 = vrot.lane.b32.xlu0 %v299_v2, %s1626_s9  ;;  %s238_s9 = scalar_lea.vmem [#allocation10], %s1212_s8 }
  0xdc   : > { %v295_v3 = vpop.permute.xlu1 %294 }
  0xdd   : > { %v281_v4 = vpop.permute.xlu0 %280 }
  0xde   : > { %284 = vst.msk [vmem:[#allocation2 + $0x8] sm:$0xff] %vm283_vm1, %v281_v4  ;;  %vm355_vm1 = vcmask 556448  }
  0xe0   : > { %v302_v5 = vpop.permute.xlu1 %301 }
  0xe1   : > { %v288_v6 = vpop.permute.xlu0 %287 }
  0xe2   : > { %291 = vst.msk [vmem:[#allocation2 + $0x8] sm:$0xff] %vm290_vm2, %v288_v6  ;;  %vm1635_vm2 = vmmov 0  }
  0xe3   : > { %298 = vst.msk [vmem:[#allocation2 + $0x8] sm:$0xff] %vm297_vm3, %v295_v3  ;;  %1132 = vmatprep.mubr.msk.f32.mxu1 %vm1635_vm2, %v1610_v0  ;;  %vm374_vm3 = vcmask 1039360  }
  0xe4   : > { %305 = vst.msk [vmem:[#allocation2 + $0x8] sm:$0xff] %vm304_vm4, %v302_v5  ;;  %v309_v7 = vpop.permute.xlu1 %308  ;;  %vm396_vm4 = vcmask 900096  }
  0xe5   : > { %v246_v8 = vpop.permute.xlu0 %245  ;;  %312 = vst.msk [vmem:[#allocation2 + $0x8] sm:$0xff] %vm311_vm5, %v309_v7  ;;  %vm385_vm5 = vcmask 1031168  }
  0xe6   : > { %249 = vst.msk [vmem:[#allocation2] sm:$0xff] %vm248_vm6, %v246_v8  ;;  %vm407_vm6 = vcmask 891904  }
  0xe8   : > { %v253_v9 = vpop.permute.xlu1 %252 }
  0xe9   : > { %v330_v10 = vpop.permute.xlu0 %329  ;;  %256 = vst.msk [vmem:[#allocation2] sm:$0xff] %vm255_vm7, %v253_v9  ;;  %vm418_vm7 = vcmask 883712  }
  0xea   : > { %335 = vst.msk [vmem:[#allocation2 + $0x10] sm:$0xff] %vm334_vm8, %v330_v10  ;;  %vm429_vm8 = vcmask 752640  }
  0xec   : > { %v339_v11 = vpop.permute.xlu1 %338 }
  0xed   : > { %v316_v12 = vpop.permute.xlu0 %315  ;;  %342 = vst.msk [vmem:[#allocation2 + $0x10] sm:$0xff] %vm341_vm9, %v339_v11  ;;  %vm440_vm9 = vcmask 744448  }
  0xee   : > { %319 = vst.msk [vmem:[#allocation2 + $0x8] sm:$0xff] %vm318_vm10, %v316_v12  ;;  %vm451_vm10 = vcmask 736256  }
  0xf0   : > { %v323_v13 = vpop.permute.xlu1 %322 }
  0xf1   : > { %v260_v14 = vpop.permute.xlu0 %259  ;;  %326 = vst.msk [vmem:[#allocation2 + $0x8] sm:$0xff] %vm325_vm11, %v323_v13  ;;  %vm456_vm11 = vcmask 588800  }
  0xf2   : > { %263 = vst.msk [vmem:[#allocation2] sm:$0xff] %vm262_vm12, %v260_v14 }
  0xf3   : > { %333 = vst.msk [vmem:[#allocation2 + $0x8] sm:$0xff] %vm332_vm13, %v330_v10 }
  0xf4   : > { %v267_v15 = vpop.permute.xlu1 %266 }
  0xf5   : > { %v346_v16 = vpop.permute.xlu0 %345  ;;  %270 = vst.msk [vmem:[#allocation2] sm:$0xff] %vm269_vm14, %v267_v15 }
  0xf6   : > { %349 = vst.msk [vmem:[#allocation2 + $0x10] sm:$0xff] %vm348_vm15, %v346_v16  ;;  %vm562_vm15 = vcmask 1047704  }
  0xf8   : > { %v274_v18 = vpop.permute.xlu1 %273 }
  0xf9   : > { %v353_v19 = vpop.permute.xlu0 %352  ;;  %277 = vst.msk [vmem:[#allocation2] sm:$0xff] %vm276_vm0, %v274_v18  ;;  %vm557_vm0 = vcmask 154624  }
  0xfa   : > { %356 = vst.msk [vmem:[#allocation2 + $0x10] sm:$0xff] %vm355_vm1, %v353_v19  ;;  %v1860_v23 = vld [vmem:[#allocation2 + $0x8] sm:$0xff]  ;;  %vm677_vm1 = vcmask 711832  }
 0x100   : > { %v1848_v20 = vld [vmem:[#allocation2] sm:$0xff] }
 0x101   : > { %v1850_v21 = vld [vmem:[#allocation2 + $0x10] sm:$0xff] }
 0x102   : > { %v1314_v22 = vpack.i.bf16 %v1850_v21, %v1848_v20  ;;  %v1339_v24 = vpack.i.bf16 %v1850_v21, %v1860_v23 }
 0x104   : > { %1315 = vrot.lane.b32.xlu0 %v1314_v22, %s1628_s21  ;;  %1310 = vrot.lane.b32.xlu1 %v1314_v22, %s1629_s23 }
 0x108   : > { %1325 = vrot.lane.b32.xlu0 %v1314_v22, %s1630_s27  ;;  %1320 = vrot.lane.b32.xlu1 %v1314_v22, %s1631_s5 }
 0x10c   : > { %1335 = vrot.lane.b32.xlu0 %v1314_v22, %s1632_s6  ;;  %1330 = vrot.lane.b32.xlu1 %v1314_v22, %s1633_s7 }
 0x110   : > { %1340 = vrot.lane.b32.xlu0 %v1339_v24, %s1629_s23  ;;  %1350 = vrot.lane.b32.xlu1 %v1339_v24, %s1631_s5 }
 0x114   : > { %1345 = vrot.lane.b32.xlu0 %v1339_v24, %s1628_s21  ;;  %1360 = vrot.lane.b32.xlu1 %v1339_v24, %s1633_s7 }
 0x118   : > { %1355 = vrot.lane.b32.xlu0 %v1339_v24, %s1630_s27  ;;  %1370 = vrot.lane.b32.xlu1 %v1339_v24, %s1634_s10 }
 0x11c   : > { %1365 = vrot.lane.b32.xlu0 %v1339_v24, %s1632_s6  ;;  %1375 = vrot.lane.b32.xlu1 %v1314_v22, %s1634_s10 }
 0x120   : > { %447 = vrot.lane.b32.xlu0 %v1860_v23, %s1636_s11  ;;  %449 = vrot.lane.b32.xlu1 %v1850_v21, %s1636_s11 }
 0x124   : > { %445 = vrot.lane.b32.xlu0 %v1848_v20, %s1636_s11  ;;  %589 = vrot.lane.b32.xlu1 %v1850_v21, %s1636_s11 }
 0x176   : > { %v1316_v25 = vpop.permute.xlu0 %1315  ;;  %v1311_v26 = vpop.permute.xlu1 %1310 }
 0x177   : > { %v1313_v27 = vunpack.i.h.bf16 %v1311_v26  ;;  %v1318_v31 = vunpack.i.h.bf16 %v1316_v25  ;;  %v1312_v41 = vunpack.i.l.bf16 %v1311_v26  ;;  %v1317_v53 = vunpack.i.l.bf16 %v1316_v25 }
 0x179   : > { %v1173_v28 = vpack.c.bf16 %v1313_v27, %v1850_v21 }
 0x17a   : > { %v1883_v29 = vpop.permute.xlu0 %1325  ;;  %v1321_v30 = vpop.permute.xlu1 %1320 }
 0x17b   : > { %v1323_v32 = vunpack.i.h.bf16 %v1321_v30  ;;  %1174 = vmatpush3.bf16.msra.mxu1 %v1173_v28  ;;  %v1328_v36 = vunpack.i.h.bf16 %v1883_v29  ;;  %v1322_v48 = vunpack.i.l.bf16 %v1321_v30  ;;  %v1327_v3 = vunpack.i.l.bf16 %v1883_v29 }
 0x17c   : > { %1175 = vmatprep.subr.bf16.mxu1 %v1627_v17 }
 0x17d   : > { %v1176_v33 = vpack.c.bf16 %v1323_v32, %v1318_v31 }
 0x17e   : > { %v1886_v34 = vpop.permute.xlu0 %1335  ;;  %v1331_v35 = vpop.permute.xlu1 %1330 }
 0x17f   : > { %v1333_v37 = vunpack.i.h.bf16 %v1331_v35  ;;  %1177 = vmatpush3.bf16.msra.mxu1 %v1176_v33  ;;  %v1332_v4 = vunpack.i.l.bf16 %v1331_v35  ;;  %v1338_v13 = vunpack.i.h.bf16 %v1886_v34  ;;  %v1337_v14 = vunpack.i.l.bf16 %v1886_v34 }
 0x180   : > { %1178 = vmatprep.subr.bf16.mxu1 %v1627_v17 }
 0x181   : > { %v1179_v38 = vpack.c.bf16 %v1333_v37, %v1328_v36 }
 0x182   : > { %v1341_v39 = vpop.permute.xlu0 %1340  ;;  %v1351_v40 = vpop.permute.xlu1 %1350 }
 0x183   : > { %v1343_v42 = vunpack.i.h.bf16 %v1341_v39  ;;  %v1342_v43 = vunpack.i.l.bf16 %v1341_v39  ;;  %1180 = vmatpush3.bf16.msra.mxu1 %v1179_v38  ;;  %v1353_v44 = vunpack.i.h.bf16 %v1351_v40  ;;  %v1352_v45 = vunpack.i.l.bf16 %v1351_v40  ;;  %v357_v40 = vld [vmem:[#allocation7] sm:$0xff] }
 0x184   : > { %1181 = vmatprep.subr.bf16.mxu1 %v1627_v17 }
 0x185   : > { %v376_v46 = vsel %vm374_vm3, %v1342_v43, %v1343_v42  ;;  %v375_v47 = vsel %vm374_vm3, %v1312_v41, %v1342_v43  ;;  %v398_v56 = vsel %vm396_vm4, %v1352_v45, %v1353_v44  ;;  %v397_v57 = vsel %vm396_vm4, %v1322_v48, %v1352_v45  ;;  %v537_v44 = vld [vmem:[%s2027_s3] sm:$0x3] }
 0x186   : > { %v1346_v49 = vpop.permute.xlu0 %1345  ;;  %v1361_v50 = vpop.permute.xlu1 %1360  ;;  %v1156_v51 = vpack.c.bf16 %v376_v46, %v1860_v23  ;;  %v1158_v52 = vpack.c.bf16 %v375_v47, %v1848_v20  ;;  %v539_v41 = vlaneseq }
 0x187   : > { %v1348_v54 = vunpack.i.h.bf16 %v1346_v49  ;;  %v1347_v55 = vunpack.i.l.bf16 %v1346_v49  ;;  %v1363_v58 = vunpack.i.h.bf16 %v1361_v50  ;;  %v1362_v59 = vunpack.i.l.bf16 %v1361_v50 }
 0x188   : > { %1157 = vmatprep.subr.bf16.mxu0 %v1156_v51  ;;  %v540_v42 = vshrl.u32 %v539_v41, 7 }
 0x189   : > { %1159 = vmatpush1.bf16.msra.mxu0 %v1158_v52  ;;  %v387_v60 = vsel %vm385_vm5, %v1347_v55, %v1348_v54  ;;  %v386_v61 = vsel %vm385_vm5, %v1317_v53, %v1347_v55  ;;  %v420_v10 = vsel %vm418_vm7, %v1362_v59, %v1363_v58  ;;  %v419_v12 = vsel %vm418_vm7, %v1332_v4, %v1362_v59 }
 0x18a   : > { %v1356_v62 = vpop.permute.xlu0 %1355  ;;  %v1371_v63 = vpop.permute.xlu1 %1370  ;;  %v1160_v1 = vpack.c.bf16 %v398_v56, %v387_v60  ;;  %v1162_v2 = vpack.c.bf16 %v397_v57, %v386_v61  ;;  %v541_v43 = vsub.s32 0, %v540_v42  ;;  %v545_v45 = vsub.s32 1, %v540_v42  ;;  %v1087_v60 = vld [vmem:[%s2027_s3 + $0x2] ss:$0 sm:$0xff] }
 0x18b   : > { %v1358_v5 = vunpack.i.h.bf16 %v1356_v62  ;;  %v1357_v6 = vunpack.i.l.bf16 %v1356_v62  ;;  %v1373_v7 = vunpack.i.h.bf16 %v1371_v63  ;;  %v1372_v8 = vunpack.i.l.bf16 %v1371_v63 }
 0x18c   : > { %1161 = vmatprep.subr.bf16.mxu0 %v1160_v1  ;;  %v542_v49 = vrot.slane %v537_v44, %v541_v43  ;;  %v546_v53 = vrot.slane %v537_v44, %v545_v45 }
 0x18d   : > { %1163 = vmatpush1.bf16.msra.mxu0 %v1162_v2  ;;  %v409_v9 = vsel %vm407_vm6, %v1357_v6, %v1358_v5  ;;  %v408_v11 = vsel %vm407_vm6, %v1327_v3, %v1357_v6  ;;  %v442_v27 = vsel %vm440_vm9, %v1372_v8, %v1373_v7 }
 0x18e   : > { %v1366_v15 = vpop.permute.xlu0 %1365  ;;  %v1376_v16 = vpop.permute.xlu1 %1375  ;;  %v1164_v18 = vpack.c.bf16 %v420_v10, %v409_v9  ;;  %v1166_v19 = vpack.c.bf16 %v419_v12, %v408_v11 }
 0x18f   : > { %v1368_v22 = vunpack.i.h.bf16 %v1366_v15  ;;  %v1367_v24 = vunpack.i.l.bf16 %v1366_v15  ;;  %v1378_v25 = vunpack.i.h.bf16 %v1376_v16  ;;  %v1377_v26 = vunpack.i.l.bf16 %v1376_v16 }
 0x190   : > { %1165 = vmatprep.subr.bf16.mxu0 %v1164_v18 }
 0x191   : > { %v1182_v28 = vpack.c.bf16 %v1378_v25, %v1338_v13  ;;  %1167 = vmatpush1.bf16.msra.mxu0 %v1166_v19  ;;  %v431_v29 = vsel %vm429_vm8, %v1367_v24, %v1368_v22  ;;  %v430_v30 = vsel %vm429_vm8, %v1337_v14, %v1367_v24  ;;  %v441_v31 = vsel %vm440_vm9, %v1377_v26, %v1372_v8 }
 0x192   : > { %v448_v32 = vpop.permute.xlu0 %447  ;;  %v450_v33 = vpop.permute.xlu1 %449  ;;  %v1168_v34 = vpack.c.bf16 %v442_v27, %v431_v29  ;;  %v1170_v35 = vpack.c.bf16 %v441_v31, %v430_v30 }
 0x193   : > { %1183 = vmatpush3.bf16.msra.mxu1 %v1182_v28  ;;  %v453_v36 = vsel %vm451_vm10, %v448_v32, %v450_v33 }
 0x194   : > { %1169 = vmatprep.subr.bf16.mxu0 %v1168_v34  ;;  %1130 = vmatprep.subr.mxu1 %v1610_v0 }
 0x195   : > { %1171 = vmatpush1.bf16.msra.mxu0 %v1170_v35 }
 0x196   : > { %v446_v37 = vpop.permute.xlu0 %445  ;;  %v590_v38 = vpop.permute.xlu1 %589  ;;  %476 = vmatprep.subr.mxu0 %v453_v36 }
 0x197   : > { %1131 = vmatpush3.msra.mxu1 %v590_v38  ;;  %v452_v39 = vsel %vm451_vm10, %v446_v37, %v448_v32 }
 0x198   : > { %1133 = vmatmul.mubr.msk.f32.vlgmr.msra.gmra.mrb[0].mxu1 %vm456_vm11, %v357_v40  ;;  %1200 = vmatprep.subr.bf16.mxu1 %v1627_v17 }
 0x199   : > { %477 = vmatpush1.msra.mxu0 %v452_v39  ;;  %1153 = vmatprep.mubr.msk.f32.mxu1 %vm1635_vm2, %v1610_v0 }
 0x19a   : > { %1085 = vmatmul.mubr.msk.f32.vlgmr.msra.gmra.mrb[0].mxu0 %vm456_vm11, %v357_v40 }
 0x19b   : > { %848 = vmatprep.mubr.f32.mxu0 %v1610_v0 }
 0x26b   : > { %v658_v46 = vpop.f32.mrb[0].mxu1 }
 0x26c   : > { %v1134_v47 = vpop.f32.mrb[1].mxu1  ;;  %v663_v52 = vmul.f32 0.01, %v658_v46  ;;  %vm662_vm14 = vcmp.gt.f32.partialorder %v658_v46, 0.0 }
 0x26d   : > { %v526_v48 = vpop.f32.mrb[0].mxu0 }
 0x26e   : > { %vm531_vm12 = vcmp.gt.f32.partialorder %v526_v48, 0.0  ;;  %v533_v50 = vmul.f32 0.01, %v526_v48  ;;  %v528_v51 = vpop.f32.mrb[1].mxu0  ;;  %v664_v58 = vsel %vm662_vm14, %v658_v46, %v663_v52 }
 0x26f   : > { %vm532_vm13 = vcmp.gt.f32.partialorder %v528_v51, 0.0  ;;  %v534_v54 = vmul.f32 0.01, %v528_v51  ;;  %v672_v61 = vmul.f32 %v1087_v60, %v664_v58 }
 0x270   : > { %v535_v55 = vsel %vm531_vm12, %v526_v48, %v533_v50 }
 0x271   : > { %v536_v56 = vsel %vm532_vm13, %v528_v51, %v534_v54  ;;  %v549_v57 = vmul.f32 %v542_v49, %v535_v55 }
 0x272   : > { %v550_v59 = vmul.f32 %v546_v53, %v536_v56 }
 0x273   : > { %553 = vrot.lane.b32.xlu0 %v549_v57, %s1637_s26 }
 0x274   : > { %555 = vrot.lane.b32.xlu1 %v550_v59, %s1637_s26 }
 0x277   : > { %674 = vrot.lane.b32.xlu0 %v672_v61, %s1637_s26 }
 0x2e5   : > { %v554_v62 = vpop.permute.xlu0 %553 }
 0x2e6   : > { %563 = vst.msk [vmem:[#allocation3] sm:$0xff] %vm562_vm15, %v554_v62  ;;  %v556_v63 = vpop.permute.xlu1 %555 }
 0x2e7   : > { %v558_v1 = vsel %vm557_vm0, %v554_v62, %v556_v63  ;;  %565 = vst.msk [vmem:[#allocation3 + $0x10] sm:$0xff] %vm557_vm0, %v556_v63 }
 0x2e9   : > { %v675_v2 = vpop.permute.xlu0 %674 }
 0x2ea   : > { %678 = vst.msk [vmem:[#allocation3 + $0x10] sm:$0xff] %vm677_vm1, %v675_v2 }
 0x2ed   : > { %v679_v3 = vld [vmem:[#allocation3] sm:$0xff] }
 0x2f1   : > { %v863_v4 = vld [vmem:[#allocation3 + $0x10] sm:$0xff] }
 0x2f2   : > { %v1384_v5 = vpack.i.bf16 %v863_v4, %v679_v3  ;;  %v1379_v6 = vpack.i.bf16 %v863_v4, %v558_v1 }
 0x2f4   : > { %1385 = vrot.lane.b32.xlu0 %v1384_v5, %s1629_s23  ;;  %1380 = vrot.lane.b32.xlu1 %v1379_v6, %s1629_s23 }
 0x2f8   : > { %1395 = vrot.lane.b32.xlu0 %v1379_v6, %s1631_s5  ;;  %1390 = vrot.lane.b32.xlu1 %v1379_v6, %s1628_s21 }
 0x2fc   : > { %1405 = vrot.lane.b32.xlu0 %v1384_v5, %s1631_s5  ;;  %1400 = vrot.lane.b32.xlu1 %v1384_v5, %s1628_s21  ;;  %s984_s21 = sshll.u32 %s238_s9, 4  ;;  %s1980_s5 = scalar_lea.hbm %s2028_s4, %s1213_s25  ;;  %s1982_s21 = int_to_ptr.vmem [resolvable:$true] %s984_s21 }
 0x300   : > { %1415 = vrot.lane.b32.xlu0 %v1379_v6, %s1633_s7  ;;  %1410 = vrot.lane.b32.xlu1 %v1379_v6, %s1630_s27 }
 0x304   : > { %1425 = vrot.lane.b32.xlu0 %v1384_v5, %s1633_s7  ;;  %1420 = vrot.lane.b32.xlu1 %v1384_v5, %s1630_s27  ;;  %s1638_s7 = smov [#allocation10]  }
 0x308   : > { %1435 = vrot.lane.b32.xlu0 %v1379_v6, %s1634_s10  ;;  %1430 = vrot.lane.b32.xlu1 %v1379_v6, %s1632_s6 }
 0x30c   : > { %1445 = vrot.lane.b32.xlu0 %v1384_v5, %s1634_s10  ;;  %1440 = vrot.lane.b32.xlu1 %v1384_v5, %s1632_s6  ;;  %s1535_s6 = scalar_lea.vmem %s1982_s21, 384  ;;  %s1539_s10 = sshll.u32 %s1638_s7, 4  ;;  %s1540_s10 = int_to_ptr.vmem [resolvable:$false] %s1539_s10 }
 0x30d   : > { %p1536_p2 = scmp.ne.s32.totalorder %s1982_s21, %s1535_s6  ;;  %p1542_p8 = scmp.lt.s32.totalorder %s1982_s21, %s1540_s10 }
 0x30f   : > { %p1537_p1 = pnand %p1536_p2, %p1783_p6 }
 0x310   : > { %759 = vrot.lane.b32.xlu0 %v863_v4, %s1636_s11  ;;  %757 = vrot.lane.b32.xlu1 %v558_v1, %s1636_s11 }
 0x311   : > { %p1538_p4 = pneg %p1537_p1 }
 0x314   : > { %886 = vrot.lane.b32.xlu0 %v863_v4, %s1636_s11  ;;  %755 = vrot.lane.b32.xlu1 %v679_v3, %s1636_s11  ;;  %s1541_s11 = scalar_lea.vmem %s1540_s10, 768 }
 0x315   : > { %p1543_p12 = scmp.lt.s32.totalorder %s1541_s11, %s1535_s6 }
 0x317   : > { %p1544_p3 = por %p1543_p12, %p1542_p8 }
 0x318   : > { %773 = vrot.lane.b32.xlu0 %v1860_v23, %s1630_s27  ;;  %771 = vrot.lane.b32.xlu1 %v1848_v20, %s1630_s27 }
 0x319   : > { %p1545_p7 = pnand %p1544_p3, %p1538_p4 }
 0x31c   : > { %891 = vrot.lane.b32.xlu0 %v1850_v21, %s1630_s27  ;;  %775 = vrot.lane.b32.xlu1 %v1850_v21, %s1630_s27 }
 0x366   : > { %v1386_v7 = vpop.permute.xlu0 %1385  ;;  %v1381_v8 = vpop.permute.xlu1 %1380 }
 0x367   : > { %v1388_v9 = vunpack.i.h.bf16 %v1386_v7  ;;  %v1387_v10 = vunpack.i.l.bf16 %v1386_v7  ;;  %v1383_v11 = vunpack.i.h.bf16 %v1381_v8  ;;  %v1382_v12 = vunpack.i.l.bf16 %v1381_v8 }
 0x369   : > { %v1201_v13 = vpack.c.bf16 %v1388_v9, %v863_v4  ;;  %v691_v14 = vsel %vm374_vm3, %v1387_v10, %v1382_v12  ;;  %v692_v23 = vsel %vm374_vm3, %v1382_v12, %v1383_v11  ;;  %vm967_vm3 = vcmask 556032  }
 0x36a   : > { %v1186_v15 = vpack.c.bf16 %v691_v14, %v679_v3  ;;  %v1396_v16 = vpop.permute.xlu0 %1395  ;;  %v1391_v20 = vpop.permute.xlu1 %1390  ;;  %v1184_v18 = vpack.c.bf16 %v692_v23, %v558_v1  ;;  %v358_v23 = vld [vmem:[#allocation9] sm:$0xff] }
 0x36b   : > { %v1398_v19 = vunpack.i.h.bf16 %v1396_v16  ;;  %v1397_v22 = vunpack.i.l.bf16 %v1396_v16  ;;  %v1393_v24 = vunpack.i.h.bf16 %v1391_v20  ;;  %v1392_v25 = vunpack.i.l.bf16 %v1391_v20  ;;  %1202 = vmatpush3.bf16.msra.mxu1 %v1201_v13 }
 0x36c   : > { %1185 = vmatprep.subr.bf16.mxu0 %v1184_v18  ;;  %1203 = vmatprep.subr.bf16.mxu1 %v1627_v17 }
 0x36d   : > { %1187 = vmatpush1.bf16.msra.mxu0 %v1186_v15  ;;  %v702_v21 = vsel %vm385_vm5, %v1392_v25, %v1393_v24  ;;  %v712_v26 = vsel %vm396_vm4, %v1397_v22, %v1398_v19 }
 0x36e   : > { %v1406_v27 = vpop.permute.xlu0 %1405  ;;  %v1401_v28 = vpop.permute.xlu1 %1400  ;;  %v1188_v29 = vpack.c.bf16 %v712_v26, %v702_v21 }
 0x36f   : > { %v1408_v30 = vunpack.i.h.bf16 %v1406_v27  ;;  %v1407_v31 = vunpack.i.l.bf16 %v1406_v27  ;;  %v1403_v32 = vunpack.i.h.bf16 %v1401_v28  ;;  %v1402_v33 = vunpack.i.l.bf16 %v1401_v28 }
 0x370   : > { %1189 = vmatprep.subr.bf16.mxu0 %v1188_v29 }
 0x371   : > { %v711_v34 = vsel %vm396_vm4, %v1407_v31, %v1397_v22  ;;  %v1204_v35 = vpack.c.bf16 %v1408_v30, %v1403_v32  ;;  %v701_v36 = vsel %vm385_vm5, %v1402_v33, %v1392_v25 }
 0x372   : > { %v1190_v37 = vpack.c.bf16 %v711_v34, %v701_v36  ;;  %v1416_v38 = vpop.permute.xlu0 %1415  ;;  %v1411_v39 = vpop.permute.xlu1 %1410 }
 0x373   : > { %v1418_v40 = vunpack.i.h.bf16 %v1416_v38  ;;  %v1417_v41 = vunpack.i.l.bf16 %v1416_v38  ;;  %v1413_v42 = vunpack.i.h.bf16 %v1411_v39  ;;  %v1412_v43 = vunpack.i.l.bf16 %v1411_v39  ;;  %1205 = vmatpush3.bf16.msra.mxu1 %v1204_v35 }
 0x374   : > { %1191 = vmatpush1.bf16.msra.mxu0 %v1190_v37  ;;  %1206 = vmatprep.subr.bf16.mxu1 %v1627_v17 }
 0x375   : > { %v722_v44 = vsel %vm407_vm6, %v1412_v43, %v1413_v42  ;;  %v732_v45 = vsel %vm418_vm7, %v1417_v41, %v1418_v40 }
 0x376   : > { %v1426_v46 = vpop.permute.xlu0 %1425  ;;  %v1421_v47 = vpop.permute.xlu1 %1420  ;;  %v1192_v48 = vpack.c.bf16 %v732_v45, %v722_v44 }
 0x377   : > { %v1428_v49 = vunpack.i.h.bf16 %v1426_v46  ;;  %v1427_v50 = vunpack.i.l.bf16 %v1426_v46  ;;  %v1423_v51 = vunpack.i.h.bf16 %v1421_v47  ;;  %v1422_v52 = vunpack.i.l.bf16 %v1421_v47 }
 0x378   : > { %1193 = vmatprep.subr.bf16.mxu0 %v1192_v48 }
 0x379   : > { %v731_v53 = vsel %vm418_vm7, %v1427_v50, %v1417_v41  ;;  %v1207_v54 = vpack.c.bf16 %v1428_v49, %v1423_v51  ;;  %v721_v55 = vsel %vm407_vm6, %v1422_v52, %v1412_v43 }
 0x37a   : > { %v1194_v56 = vpack.c.bf16 %v731_v53, %v721_v55  ;;  %v1436_v57 = vpop.permute.xlu0 %1435  ;;  %v1431_v58 = vpop.permute.xlu1 %1430 }
 0x37b   : > { %v1438_v59 = vunpack.i.h.bf16 %v1436_v57  ;;  %v1437_v60 = vunpack.i.l.bf16 %v1436_v57  ;;  %v1433_v61 = vunpack.i.h.bf16 %v1431_v58  ;;  %v1432_v62 = vunpack.i.l.bf16 %v1431_v58  ;;  %1208 = vmatpush3.bf16.msra.mxu1 %v1207_v54 }
 0x37c   : > { %1195 = vmatpush1.bf16.msra.mxu0 %v1194_v56  ;;  %1209 = vmatprep.subr.bf16.mxu1 %v1627_v17 }
 0x37d   : > { %v742_v63 = vsel %vm429_vm8, %v1432_v62, %v1433_v61  ;;  %v752_v1 = vsel %vm440_vm9, %v1437_v60, %v1438_v59 }
 0x37e   : > { %v1446_v2 = vpop.permute.xlu0 %1445  ;;  %v1441_v3 = vpop.permute.xlu1 %1440  ;;  %v1196_v4 = vpack.c.bf16 %v752_v1, %v742_v63 }
 0x37f   : > { %v1448_v5 = vunpack.i.h.bf16 %v1446_v2  ;;  %v1447_v6 = vunpack.i.l.bf16 %v1446_v2  ;;  %v1443_v7 = vunpack.i.h.bf16 %v1441_v3  ;;  %v1442_v8 = vunpack.i.l.bf16 %v1441_v3 }
 0x380   : > { %1197 = vmatprep.subr.bf16.mxu0 %v1196_v4 }
 0x381   : > { %v751_v9 = vsel %vm440_vm9, %v1447_v6, %v1437_v60  ;;  %v1210_v10 = vpack.c.bf16 %v1448_v5, %v1443_v7  ;;  %v741_v11 = vsel %vm429_vm8, %v1442_v8, %v1432_v62 }
 0x382   : > { %v1198_v12 = vpack.c.bf16 %v751_v9, %v741_v11  ;;  %v760_v13 = vpop.permute.xlu0 %759  ;;  %v758_v17 = vpop.permute.xlu1 %757 }
 0x383   : > { %1211 = vmatpush3.bf16.msra.mxu1 %v1210_v10  ;;  %v762_v14 = vsel %vm451_vm10, %v758_v17, %v760_v13 }
 0x384   : > { %1199 = vmatpush1.bf16.msra.mxu0 %v1198_v12  ;;  %1151 = vmatprep.subr.mxu1 %v1610_v0 }
 0x385   : > { %800 = vmatprep.subr.mxu0 %v762_v14 }
 0x386   : > { %v887_v15 = vpop.permute.xlu0 %886  ;;  %v756_v16 = vpop.permute.xlu1 %755 }
 0x387   : > { %v761_v20 = vsel %vm451_vm10, %v756_v16, %v758_v17  ;;  %1152 = vmatpush3.msra.mxu1 %v887_v15 }
 0x388   : > { %801 = vmatpush1.msra.mxu0 %v761_v20  ;;  %1154 = vmatmul.mubr.msk.f32.vlgmr.msra.gmra.mrb[2].mxu1 %vm456_vm11, %v358_v23 }
 0x389   : > { %1088 = vmatmul.mubr.msk.f32.vlgmr.msra.gmra.mrb[2].mxu0 %vm456_vm11, %v358_v23 }
 0x38a   : > { %v772_v18 = vpop.permute.xlu1 %771  ;;  %v774_v19 = vpop.permute.xlu0 %773 }
 0x38b   : > { %v777_v21 = vsel %vm407_vm6, %v772_v18, %v774_v19 }
 0x38e   : > { %v776_v22 = vpop.permute.xlu1 %775  ;;  %v892_v24 = vpop.permute.xlu0 %891 }
 0x38f   : > { %v778_v29 = vsel %vm407_vm6, %v774_v19, %v776_v22 }
 0x45b   : > { %v960_v25 = vpop.f32.mrb[2].mxu1 }
 0x45c   : > { %v961_v0 = vadd.f32 %v960_v25, %v892_v24  ;;  %v850_v26 = vpop.f32.mrb[2].mxu0  ;;  %v1155_v27 = vpop.f32.mrb[3].mxu1 }
 0x45d   : > { %v851_v28 = vadd.f32 %v850_v26, %v777_v21  ;;  %v852_v30 = vpop.f32.mrb[3].mxu0 }
 0x45e   : > { %vm964_vm2 = vcmp.gt.f32.partialorder %v961_v0, 0.0  ;;  %v965_v31 = vmul.f32 0.01, %v961_v0  ;;  %v853_v32 = vadd.f32 %v852_v30, %v778_v29 }
 0x45f   : > { %vm855_vm4 = vcmp.gt.f32.partialorder %v851_v28, 0.0  ;;  %v857_v33 = vmul.f32 0.01, %v851_v28 }
 0x460   : > { %v966_v34 = vsel %vm964_vm2, %v961_v0, %v965_v31  ;;  %vm856_vm5 = vcmp.gt.f32.partialorder %v853_v32, 0.0  ;;  %v858_v35 = vmul.f32 0.01, %v853_v32 }
 0x461   : > { %968 = vst.msk [vmem:[%s238_s9 + $0x10] sm:$0xff] %vm967_vm3, %v966_v34  ;;  %v859_v36 = vsel %vm855_vm4, %v851_v28, %v857_v33 }
 0x462   : > { %861 = vst [vmem:[%s238_s9] sm:$0xff] %v859_v36  ;;  %v860_v37 = vsel %vm856_vm5, %v853_v32, %v858_v35 }
 0x463   : > { %862 = vst [vmem:[%s238_s9 + $0x8] sm:$0xff] %v860_v37 }
 0x464   : > { %1548 = shalt.err (!%p1545_p7)
}
 0x465   : > { %s1549_s30 = scalar_lea.hbm %s1980_s5, 384  ;;  %s1553_s20 = scalar_lea.hbm %s2028_s4, 768 }
 0x466   : > { %p1550_p10 = scmp.ne.s32.totalorder %s1980_s5, %s1549_s30  ;;  %p1554_p0 = scmp.lt.u32.totalorder %s1980_s5, %s2028_s4 }
 0x467   : > { %p1555_p9 = scmp.lt.u32.totalorder %s1553_s20, %s1549_s30  ;;  %p1557_p2 = scmp.lt.u32.totalorder %s1549_s30, %s1980_s5 }
 0x468   : > { %p1551_p13 = pnand %p1550_p10, %p1783_p6 }
 0x469   : > { %p1556_p11 = por %p1555_p9, %p1554_p0 }
 0x46a   : > { %p1552_p5 = pneg %p1551_p13 }
 0x46b   : > { %p1558_p1 = por %p1557_p2, %p1556_p11 }
 0x46d   : > { %p1559_p4 = pnand %p1558_p1, %p1552_p5 }
 0x46f   : > { %1562 = shalt.err (!%p1559_p4)
}
 0x470   : > { %1224 = dma.vmem_to_hbm [thread:$0]  (%p1783_p6), %s1982_s21, 384, %s1980_s5, %s970_s19  }
 0x471 PF: > { %s996_s8 = sand.u32 1, %s1593_s15   ;;  %p2043_p8 = scmp.ne.s32.totalorder %s2033_s22, 0 }
 0x472   : > { %p2044_p12 = scmp.ge.s32.totalorder %s1605_s18, 2  ;;  %s997_s25 = scalar_lea.sflag [#allocation6], %s996_s8 }
 0x474   : > { %p1238_p3 = pnand %p2044_p12, %p2043_p8 }
 0x476   : > { %1588 = dma.done.wait (!%p1238_p3), %s997_s25, 384  }
 0x477   : > { %1590 = vsyncadd (!%p1238_p3), %s997_s25, 4294966912  ;;  %p18_p7 = scmp.ge.s32.totalorder %s1720_s29, 4   ;;  %s2045_s15 = smov %s1597_s16 }
 0x478   : > { %s2046_s16 = smov %s1601_s17  ;;  %s2047_s17 = smov %s1779_s28 }
 0x479   : > { %s2048_s18 = smov %s1720_s29  ;;  %20 = sbr.rel (!%p18_p7) target bundleno = 6 (0x6), region = 89 }
 0x480   :  { %1002 = vsyncpa [#allocation5], 1 }
 0x481   :  { %1004 = vsyncpa [#allocation5 + $0x1], 1 }
 0x482   :  { %1005 = vsyncpa [#allocation8], 1 }
 0x483   :  { %1006 = vsyncpa [#allocation6], 1 }
 0x484   :  { %1008 = vsyncpa [#allocation6 + $0x1], 1 }

</bundles_post_ra>
